<compile_context>
chip_gen: v6e
topology: v6e:2x2x1
jax: 0.10.0
libtpu: 0.0.40
codegen_flags: <defaults>
</compile_context>

<pallas_src>
import math
import functools

import jax
import jax.numpy as jnp
from jax.experimental import pallas as pl
from jax.experimental.pallas import tpu as pltpu


def _round_up(x, m):
    return ((x + m - 1) // m) * m


# ----------------------------------------------------------------------------
# Fused single-stage kernel builder.
# ----------------------------------------------------------------------------
def make_stage_fn(*, B, L, in_dim, F, C, K, num_layers, softmax_classes,
                  out_dtype=jnp.float32, vmem_limit_bytes=64 * 1024 * 1024):
    """Returns apply(inp, mask, scale_shift, params) -> (logits (B,L,C), feat (B,L,F)).

    softmax_classes > 0: softmax over the first `softmax_classes` input channels
    (then * mask) is applied before the input conv_1x1 — this is how stages >= 2
    consume the previous stage's logits (F.softmax(out, dim=1) * mask).
    """
    nl = num_layers
    pad_needed = (K // 2) * (2 ** (nl - 1))          # largest dilation's halo
    maxpad = _round_up(max(pad_needed, 1), 8)        # 8-align -> aligned scratch stores
    Lp = L + 2 * maxpad
    twoF = 2 * F

    def kern(inp_ref, mask_ref, ss_ref,
             in_w_ref, in_b_ref,
             wcg_ref, bcg_ref, w1_ref, b1_ref,
             out_w_ref, out_b_ref,
             logits_ref, feat_ref,
             xpad_ref):
        m = mask_ref[0]                                   # (L, 1)
        inp = inp_ref[0].astype(jnp.float32)              # (L, in_dim)

        # Stages >= 2: softmax over class channels of previous logits, * mask.
        if softmax_classes > 0:
            cls = inp[:, :softmax_classes]
            cls = cls - jnp.max(cls, axis=-1, keepdims=True)
            e = jnp.exp(cls)
            # approx=False keeps exact parity with PyTorch; approx=True would put
            # the divide on the EUP slot at ~1e-4 relative error.
            sm = e * pl.reciprocal(jnp.sum(e, axis=-1, keepdims=True), approx=False)
            sm = sm * m
            if in_dim > softmax_classes:                  # use_features: raw features appended
                inp = jnp.concatenate([sm, inp[:, softmax_classes:]], axis=-1)
            else:
                inp = sm

        # Stage input conv_1x1 (+ mask).
        act = (jnp.dot(inp, in_w_ref[...], preferred_element_type=jnp.float32)
               + in_b_ref[...]) * m                       # (L, F)

        # Zero-halo running activation lives in VMEM for the whole stage.
        xpad_ref[...] = jnp.zeros_like(xpad_ref)
        xpad_ref[maxpad:maxpad + L, :] = act

        ss_all = ss_ref[0]                                # (nl, 2F) scale/shift for this row

        for i in range(nl):                               # static unroll over layers
            d = 2 ** i                                    # dilation (static per unrolled layer)
            base = maxpad - (K // 2) * d
            xp = xpad_ref[...]                            # (Lp, F)
            x_cur = xp[maxpad:maxpad + L, :]
            # Fused dilated conv + gate conv: one (L, K*F) @ (K*F, 2F) matmul.
            lhs = jnp.concatenate(
                [xp[base + k * d: base + k * d + L, :] for k in range(K)], axis=-1)
            cg = (jnp.dot(lhs, wcg_ref[i], preferred_element_type=jnp.float32)
                  + bcg_ref[i])                           # (L, 2F)
            h = cg[:, :F] * jax.nn.sigmoid(cg[:, F:])     # conv * sigmoid(gate); ch_dropout=id
            h = (jnp.dot(h, w1_ref[i], preferred_element_type=jnp.float32)
                 + b1_ref[i])                             # layer conv_1x1
            h = jnp.maximum(h, 0.0)                       # relu; dropout = id (eval)
            scale = ss_all[i:i + 1, :F]                   # (1, F) hoisted time-MLP scale
            shift = ss_all[i:i + 1, F:]                   # (1, F) hoisted time-MLP shift
            h = h * (scale + 1.0) + shift
            act = (x_cur + h) * m                         # residual + mask
            xpad_ref[maxpad:maxpad + L, :] = act

        # Stage outputs (conv_out fused into the same kernel).
        feat_ref[0] = (act * m).astype(feat_ref.dtype)
        logits = (jnp.dot(act, out_w_ref[...], preferred_element_type=jnp.float32)
                  + out_b_ref[...])
        logits_ref[0] = (logits * m).astype(logits_ref.dtype)

    grid_spec = pltpu.PrefetchScalarGridSpec(
        num_scalar_prefetch=0,
        grid=(B,),
        in_specs=[
            pl.BlockSpec((1, L, in_dim), lambda b: (b, 0, 0)),       # stage input
            pl.BlockSpec((1, L, 1), lambda b: (b, 0, 0)),            # mask
            pl.BlockSpec((1, nl, twoF), lambda b: (b, 0, 0)),        # per-layer scale/shift
            pl.BlockSpec((in_dim, F), lambda b: (0, 0)),             # in_w   (fetched once)
            pl.BlockSpec((1, F), lambda b: (0, 0)),                  # in_b
            pl.BlockSpec((nl, K * F, twoF), lambda b: (0, 0, 0)),    # fused conv|gate weights
            pl.BlockSpec((nl, 1, twoF), lambda b: (0, 0, 0)),        # fused conv|gate bias
            pl.BlockSpec((nl, F, F), lambda b: (0, 0, 0)),           # layer 1x1 weights
            pl.BlockSpec((nl, 1, F), lambda b: (0, 0, 0)),           # layer 1x1 bias
            pl.BlockSpec((F, C), lambda b: (0, 0)),                  # out_w
            pl.BlockSpec((1, C), lambda b: (0, 0)),                  # out_b
        ],
        out_specs=(
            pl.BlockSpec((1, L, C), lambda b: (b, 0, 0)),            # logits
            pl.BlockSpec((1, L, F), lambda b: (b, 0, 0)),            # features
        ),
        scratch_shapes=[pltpu.VMEM((Lp, F), jnp.float32)],
    )

    call = pl.pallas_call(
        kern,
        out_shape=(jax.ShapeDtypeStruct((B, L, C), out_dtype),
                   jax.ShapeDtypeStruct((B, L, F), out_dtype)),
        grid_spec=grid_spec,
        compiler_params=pltpu.CompilerParams(
            dimension_semantics=("parallel",),
            vmem_limit_bytes=vmem_limit_bytes),
    )

    def apply(inp, mask, scale_shift, p):
        return call(inp, mask, scale_shift,
                    p['in_w'], p['in_b'],
                    p['wcg'], p['bcg'], p['w1l'], p['b1l'],
                    p['out_w'], p['out_b'])

    return apply


# ----------------------------------------------------------------------------
# Wrapper-side glue (tiny per-batch ops, plain JAX).
# ----------------------------------------------------------------------------
def stage_time_mlp(t, tp, F):
    # SinusoidalPosEmb(F) -> Linear(F, 4F) -> GELU(erf) -> Linear(4F, 4F).  (B, 4F)
    half = F // 2
    freq = jnp.exp(jnp.arange(half, dtype=jnp.float32)
                   * -(math.log(10000.0) / (half - 1)))
    emb = t[:, None] * freq[None, :]
    emb = jnp.concatenate([jnp.sin(emb), jnp.cos(emb)], axis=-1)      # (B, F)
    h = emb @ tp['w1'] + tp['b1']
    h = jax.nn.gelu(h, approximate=False)                             # torch nn.GELU default
    return h @ tp['w2'] + tp['b2']                                    # (B, 4F)


def layer_scale_shift(t_emb, wt, bt):
    # Per-layer time MLP (SiLU -> Linear(4F, 2F)) hoisted out of the kernel.
    a = t_emb * jax.nn.sigmoid(t_emb)                                 # SiLU, (B, 4F)
    return jnp.einsum('bd,ldo->blo', a, wt) + bt[None]                # (B, nl, 2F)


def run_stage(stage_fn, inp, t, mask, p, F):
    t_emb = stage_time_mlp(t, p['time'], F)
    ss = layer_scale_shift(t_emb, p['wt'], p['bt'])
    return stage_fn(inp, mask, ss, p)


def diff_multi_stage_forward(params, x_ncl, t, stage_masks_ncl, cfg):
    if cfg.get('layer_type', 'gated') != 'gated':
        # TODO(synk): 'base_dr' (DiffDilatedResidualLayer) not implemented in Pallas.
        raise NotImplementedError("only layer_type='gated' is implemented")

    x = jnp.transpose(x_ncl, (0, 2, 1))                               # (B, L, dim)
    masks = jnp.transpose(stage_masks_ncl, (0, 1, 3, 2))              # (S, B, L, 1)
    B, L, dim = x.shape
    F, C = cfg['num_f_maps'], cfg['num_classes']
    K, nl = cfg['kernel_size'], cfg['num_layers']
    stage_in = C + dim if cfg['use_features'] else C

    stage1_fn = make_stage_fn(B=B, L=L, in_dim=dim, F=F, C=C, K=K,
                              num_layers=nl, softmax_classes=0, out_dtype=x.dtype)
    stageN_fn = make_stage_fn(B=B, L=L, in_dim=stage_in, F=F, C=C, K=K,
                              num_layers=nl, softmax_classes=C, out_dtype=x.dtype)

    out, feat = run_stage(stage1_fn, x, t, masks[0], params['stage1'], F)
    outputs = [out]
    for sn, sp in enumerate(params['stages']):
        m = masks[sn]                    # matches reference: stage_masks[sn] for stage sn+1
        inp = jnp.concatenate([out, x], axis=-1) if cfg['use_features'] else out
        out, feat = run_stage(stageN_fn, inp, t, m, sp, F)
        outputs.append(out)
    outputs = jnp.stack(outputs, axis=0)                              # (S, B, L, C)
    # back to PyTorch layout: outputs (S, B, C, L), features (B, F, L)
    return jnp.transpose(outputs, (0, 1, 3, 2)), jnp.transpose(feat, (0, 2, 1))


# ----------------------------------------------------------------------------
# Deterministic parameter construction in the fused layout.
#
# Conv weight convention: a PyTorch Conv1d weight (Cout, Cin, K) maps to per-tap
# matrices W_k[ci, co] = weight[co, ci, k]; the fused dilated weight is
# wcg[layer] = reshape(concat([Wc, Wg], axis=-1), (K*F, 2F)) with rows ordered
# tap-major (row = tap*F + ci).  A real-checkpoint loader must do that transpose.
# ----------------------------------------------------------------------------
def init_params(key, cfg):
    K = cfg['kernel_size']
    F = cfg['num_f_maps']
    dim = cfg['dim']
    C = cfg['num_classes']
    nl = cfg['num_layers']
    ns = cfg['num_stages']
    Tdim = 4 * F
    stage_in = C + dim if cfg['use_features'] else C
    scale = 0.05

    def rnd(k, shape):
        return scale * jax.random.normal(k, shape, jnp.float32)

    def stage_params(key, in_dim):
        ks = jax.random.split(key, 16)
        wc = rnd(ks[0], (nl, K, F, F))          # (layer, tap, Cin, Cout)
        wg = rnd(ks[1], (nl, K, F, F))
        bc = rnd(ks[2], (nl, F))
        bg = rnd(ks[3], (nl, F))
        wcg = jnp.concatenate([wc, wg], axis=-1).reshape(nl, K * F, 2 * F)
        bcg = jnp.concatenate([bc, bg], axis=-1).reshape(nl, 1, 2 * F)
        return dict(
            in_w=rnd(ks[4], (in_dim, F)), in_b=rnd(ks[5], (1, F)),
            out_w=rnd(ks[6], (F, C)), out_b=rnd(ks[7], (1, C)),
            wcg=wcg, bcg=bcg,
            w1l=rnd(ks[8], (nl, F, F)), b1l=rnd(ks[9], (nl, 1, F)),
            wt=rnd(ks[10], (nl, Tdim, 2 * F)), bt=rnd(ks[11], (nl, 2 * F)),
            time=dict(w1=rnd(ks[12], (F, Tdim)), b1=rnd(ks[13], (Tdim,)),
                      w2=rnd(ks[14], (Tdim, Tdim)), b2=rnd(ks[15], (Tdim,))))

    keys = jax.random.split(key, ns)
    return dict(stage1=stage_params(keys[0], dim),
                stages=[stage_params(keys[i], stage_in) for i in range(1, ns)])


if __name__ == "__main__":
    cfg = dict(layer_type='gated', kernel_size=3, num_stages=2, num_layers=2,
               num_f_maps=32, dim=4, num_classes=4, dropout=0.2,
               use_features=False)
    B, L = 2, 16

    key = jax.random.PRNGKey(0)
    kp, kx, kt = jax.random.split(key, 3)
    params = init_params(kp, cfg)

    x = jax.random.normal(kx, (B, cfg['dim'], L), jnp.float32)        # NCL (PyTorch layout)
    t = jax.random.uniform(kt, (B,), jnp.float32, 0.0, 100.0)         # diffusion timesteps
    mask = jnp.ones((B, 1, L), jnp.float32).at[1, :, 12:].set(0.0)    # batch row 1 padded
    stage_masks = jnp.stack([mask] * cfg['num_stages'], axis=0)       # (S, B, 1, L)

    fwd = jax.jit(functools.partial(diff_multi_stage_forward, cfg=cfg))
    outputs, feats = fwd(params, x, t, stage_masks)
    outputs, feats = jax.block_until_ready((outputs, feats))

    assert outputs.shape == (cfg['num_stages'], B, cfg['num_classes'], L)
    assert feats.shape == (B, cfg['num_f_maps'], L)
    print("KERNEL_OK")
</pallas_src>

<mosaic_0001>
module attributes {stable_mosaic.version = 11 : i64} {
  func.func @kern(%arg0: i32, %arg1: memref<1x16x4xf32, #tpu.memory_space<vmem>>, %arg2: memref<1x16x1xf32, #tpu.memory_space<vmem>>, %arg3: memref<1x2x64xf32, #tpu.memory_space<vmem>>, %arg4: memref<4x32xf32, #tpu.memory_space<vmem>>, %arg5: memref<1x32xf32, #tpu.memory_space<vmem>>, %arg6: memref<2x96x64xf32, #tpu.memory_space<vmem>>, %arg7: memref<2x1x64xf32, #tpu.memory_space<vmem>>, %arg8: memref<2x32x32xf32, #tpu.memory_space<vmem>>, %arg9: memref<2x1x32xf32, #tpu.memory_space<vmem>>, %arg10: memref<32x4xf32, #tpu.memory_space<vmem>>, %arg11: memref<1x4xf32, #tpu.memory_space<vmem>>, %arg12: memref<1x16x4xf32, #tpu.memory_space<vmem>>, %arg13: memref<1x16x32xf32, #tpu.memory_space<vmem>>, %arg14: memref<32x32xf32, #tpu.memory_space<vmem>>) attributes {dimension_semantics = [#tpu.dimension_semantics<parallel>], iteration_bounds = array<i64: 2>, scalar_prefetch = 0 : i64, scratch_operands = 1 : i64, tpu.core_type = #tpu.core_type<tc>, window_params = [{transform_indices = @transform_0, window_bounds = array<i64: 1, 16, 4>}, {transform_indices = @transform_1, window_bounds = array<i64: 1, 16, 1>}, {transform_indices = @transform_2, window_bounds = array<i64: 1, 2, 64>}, {pipeline_mode = #tpu.pipeline_mode<synchronous>, transform_indices = @transform_3, window_bounds = array<i64: 4, 32>}, {pipeline_mode = #tpu.pipeline_mode<synchronous>, transform_indices = @transform_4, window_bounds = array<i64: 1, 32>}, {pipeline_mode = #tpu.pipeline_mode<synchronous>, transform_indices = @transform_5, window_bounds = array<i64: 2, 96, 64>}, {pipeline_mode = #tpu.pipeline_mode<synchronous>, transform_indices = @transform_6, window_bounds = array<i64: 2, 1, 64>}, {pipeline_mode = #tpu.pipeline_mode<synchronous>, transform_indices = @transform_7, window_bounds = array<i64: 2, 32, 32>}, {pipeline_mode = #tpu.pipeline_mode<synchronous>, transform_indices = @transform_8, window_bounds = array<i64: 2, 1, 32>}, {pipeline_mode = #tpu.pipeline_mode<synchronous>, transform_indices = @transform_9, window_bounds = array<i64: 32, 4>}, {pipeline_mode = #tpu.pipeline_mode<synchronous>, transform_indices = @transform_10, window_bounds = array<i64: 1, 4>}, {transform_indices = @transform_11, window_bounds = array<i64: 1, 16, 4>}, {transform_indices = @transform_12, window_bounds = array<i64: 1, 16, 32>}]} {
    %c0 = arith.constant 0 : index
    %c0_0 = arith.constant 0 : index
    %c0_1 = arith.constant 0 : index
    %0 = vector.load %arg2[%c0, %c0_0, %c0_1] : memref<1x16x1xf32, #tpu.memory_space<vmem>>, vector<1x16x1xf32>
    %1 = vector.shape_cast %0 : vector<1x16x1xf32> to vector<16x1xf32>
    %c0_2 = arith.constant 0 : index
    %c0_3 = arith.constant 0 : index
    %c0_4 = arith.constant 0 : index
    %2 = vector.load %arg1[%c0_2, %c0_3, %c0_4] : memref<1x16x4xf32, #tpu.memory_space<vmem>>, vector<1x16x4xf32>
    %3 = vector.shape_cast %2 : vector<1x16x4xf32> to vector<16x4xf32>
    %c0_5 = arith.constant 0 : index
    %c0_6 = arith.constant 0 : index
    %4 = vector.load %arg4[%c0_5, %c0_6] : memref<4x32xf32, #tpu.memory_space<vmem>>, vector<4x32xf32>
    %cst = arith.constant dense<0.000000e+00> : vector<16x32xf32>
    %5 = tpu.matmul %3, %4, %cst {dimension_numbers = #tpu.dot_dimension_numbers<[1], [0], [0], [1], [0, 0, 1, 1], [], []>} : vector<16x4xf32>, vector<4x32xf32>, vector<16x32xf32> -> vector<16x32xf32>
    %c0_7 = arith.constant 0 : index
    %c0_8 = arith.constant 0 : index
    %6 = vector.load %arg5[%c0_7, %c0_8] : memref<1x32xf32, #tpu.memory_space<vmem>>, vector<1x32xf32>
    %7 = vector.broadcast %6 : vector<1x32xf32> to vector<16x32xf32>
    %8 = arith.addf %5, %7 : vector<16x32xf32>
    %9 = vector.broadcast %1 : vector<16x1xf32> to vector<16x32xf32>
    %10 = arith.mulf %8, %9 : vector<16x32xf32>
    %cst_9 = arith.constant 0.000000e+00 : f32
    %11 = vector.broadcast %cst_9 : f32 to vector<32x32xf32>
    %c0_10 = arith.constant 0 : index
    %c0_11 = arith.constant 0 : index
    %12 = vector.load %arg14[%c0_10, %c0_11] : memref<32x32xf32, #tpu.memory_space<vmem>>, vector<32x32xf32>
    tpu.vector_store %arg14[%c0_10, %c0_11], %11 {strides = array<i32>} : memref<32x32xf32, #tpu.memory_space<vmem>>, vector<32x32xf32>,
    %c8 = arith.constant 8 : index
    %c0_12 = arith.constant 0 : index
    %13 = vector.load %arg14[%c8, %c0_12] : memref<32x32xf32, #tpu.memory_space<vmem>>, vector<16x32xf32>
    tpu.vector_store %arg14[%c8, %c0_12], %10 {strides = array<i32>} : memref<32x32xf32, #tpu.memory_space<vmem>>, vector<16x32xf32>,
    %c0_13 = arith.constant 0 : index
    %c0_14 = arith.constant 0 : index
    %c0_15 = arith.constant 0 : index
    %14 = vector.load %arg3[%c0_13, %c0_14, %c0_15] : memref<1x2x64xf32, #tpu.memory_space<vmem>>, vector<1x2x64xf32>
    %15 = vector.shape_cast %14 : vector<1x2x64xf32> to vector<2x64xf32>
    %c0_16 = arith.constant 0 : index
    %c0_17 = arith.constant 0 : index
    %16 = vector.load %arg14[%c0_16, %c0_17] : memref<32x32xf32, #tpu.memory_space<vmem>>, vector<32x32xf32>
    %17 = vector.extract_strided_slice %16 {offsets = [8, 0], sizes = [16, 32], strides = [1, 1]} : vector<32x32xf32> to vector<16x32xf32>
    %18 = vector.extract_strided_slice %16 {offsets = [7, 0], sizes = [16, 32], strides = [1, 1]} : vector<32x32xf32> to vector<16x32xf32>
    %19 = vector.extract_strided_slice %16 {offsets = [8, 0], sizes = [16, 32], strides = [1, 1]} : vector<32x32xf32> to vector<16x32xf32>
    %20 = vector.extract_strided_slice %16 {offsets = [9, 0], sizes = [16, 32], strides = [1, 1]} : vector<32x32xf32> to vector<16x32xf32>
    %21 = tpu.concatenate %18, %19, %20 in 1 : vector<16x32xf32>, vector<16x32xf32>, vector<16x32xf32> -> vector<16x96xf32>
    %c0_18 = arith.constant 0 : index
    %c0_19 = arith.constant 0 : index
    %c0_20 = arith.constant 0 : index
    %22 = vector.load %arg6[%c0_18, %c0_19, %c0_20] : memref<2x96x64xf32, #tpu.memory_space<vmem>>, vector<1x96x64xf32>
    %23 = vector.shape_cast %22 : vector<1x96x64xf32> to vector<96x64xf32>
    %cst_21 = arith.constant dense<0.000000e+00> : vector<16x64xf32>
    %24 = tpu.matmul %21, %23, %cst_21 {dimension_numbers = #tpu.dot_dimension_numbers<[1], [0], [0], [1], [0, 0, 1, 1], [], []>} : vector<16x96xf32>, vector<96x64xf32>, vector<16x64xf32> -> vector<16x64xf32>
    %c0_22 = arith.constant 0 : index
    %c0_23 = arith.constant 0 : index
    %c0_24 = arith.constant 0 : index
    %25 = vector.load %arg7[%c0_22, %c0_23, %c0_24] : memref<2x1x64xf32, #tpu.memory_space<vmem>>, vector<1x1x64xf32>
    %26 = vector.shape_cast %25 : vector<1x1x64xf32> to vector<1x64xf32>
    %27 = vector.broadcast %26 : vector<1x64xf32> to vector<16x64xf32>
    %28 = arith.addf %24, %27 : vector<16x64xf32>
    %29 = vector.extract_strided_slice %28 {offsets = [0, 0], sizes = [16, 32], strides = [1, 1]} : vector<16x64xf32> to vector<16x32xf32>
    %30 = vector.extract_strided_slice %28 {offsets = [0, 32], sizes = [16, 32], strides = [1, 1]} : vector<16x64xf32> to vector<16x32xf32>
    %31 = arith.negf %30 : vector<16x32xf32>
    %32 = math.exp %31 : vector<16x32xf32>
    %cst_25 = arith.constant 1.000000e+00 : f32
    %33 = vector.broadcast %cst_25 : f32 to vector<16x32xf32>
    %34 = arith.addf %33, %32 : vector<16x32xf32>
    %35 = arith.divf %33, %34 : vector<16x32xf32>
    %36 = arith.mulf %29, %35 : vector<16x32xf32>
    %c0_26 = arith.constant 0 : index
    %c0_27 = arith.constant 0 : index
    %c0_28 = arith.constant 0 : index
    %37 = vector.load %arg8[%c0_26, %c0_27, %c0_28] : memref<2x32x32xf32, #tpu.memory_space<vmem>>, vector<1x32x32xf32>
    %38 = vector.shape_cast %37 : vector<1x32x32xf32> to vector<32x32xf32>
    %cst_29 = arith.constant dense<0.000000e+00> : vector<16x32xf32>
    %39 = tpu.matmul %36, %38, %cst_29 {dimension_numbers = #tpu.dot_dimension_numbers<[1], [0], [0], [1], [0, 0, 1, 1], [], []>} : vector<16x32xf32>, vector<32x32xf32>, vector<16x32xf32> -> vector<16x32xf32>
    %c0_30 = arith.constant 0 : index
    %c0_31 = arith.constant 0 : index
    %c0_32 = arith.constant 0 : index
    %40 = vector.load %arg9[%c0_30, %c0_31, %c0_32] : memref<2x1x32xf32, #tpu.memory_space<vmem>>, vector<1x1x32xf32>
    %41 = vector.shape_cast %40 : vector<1x1x32xf32> to vector<1x32xf32>
    %42 = vector.broadcast %41 : vector<1x32xf32> to vector<16x32xf32>
    %43 = arith.addf %39, %42 : vector<16x32xf32>
    %cst_33 = arith.constant 0.000000e+00 : f32
    %44 = vector.broadcast %cst_33 : f32 to vector<16x32xf32>
    %45 = arith.maximumf %43, %44 : vector<16x32xf32>
    %46 = vector.extract_strided_slice %15 {offsets = [0, 0], sizes = [1, 32], strides = [1, 1]} : vector<2x64xf32> to vector<1x32xf32>
    %47 = vector.extract_strided_slice %15 {offsets = [0, 32], sizes = [1, 32], strides = [1, 1]} : vector<2x64xf32> to vector<1x32xf32>
    %cst_34 = arith.constant 1.000000e+00 : f32
    %48 = vector.broadcast %cst_34 : f32 to vector<1x32xf32>
    %49 = arith.addf %46, %48 : vector<1x32xf32>
    %50 = vector.broadcast %49 : vector<1x32xf32> to vector<16x32xf32>
    %51 = arith.mulf %45, %50 : vector<16x32xf32>
    %52 = vector.broadcast %47 : vector<1x32xf32> to vector<16x32xf32>
    %53 = arith.addf %51, %52 : vector<16x32xf32>
    %54 = arith.addf %17, %53 : vector<16x32xf32>
    %55 = vector.broadcast %1 : vector<16x1xf32> to vector<16x32xf32>
    %56 = arith.mulf %54, %55 : vector<16x32xf32>
    %c8_35 = arith.constant 8 : index
    %c0_36 = arith.constant 0 : index
    %57 = vector.load %arg14[%c8_35, %c0_36] : memref<32x32xf32, #tpu.memory_space<vmem>>, vector<16x32xf32>
    tpu.vector_store %arg14[%c8_35, %c0_36], %56 {strides = array<i32>} : memref<32x32xf32, #tpu.memory_space<vmem>>, vector<16x32xf32>,
    %c0_37 = arith.constant 0 : index
    %c0_38 = arith.constant 0 : index
    %58 = vector.load %arg14[%c0_37, %c0_38] : memref<32x32xf32, #tpu.memory_space<vmem>>, vector<32x32xf32>
    %59 = vector.extract_strided_slice %58 {offsets = [8, 0], sizes = [16, 32], strides = [1, 1]} : vector<32x32xf32> to vector<16x32xf32>
    %60 = vector.extract_strided_slice %58 {offsets = [6, 0], sizes = [16, 32], strides = [1, 1]} : vector<32x32xf32> to vector<16x32xf32>
    %61 = vector.extract_strided_slice %58 {offsets = [8, 0], sizes = [16, 32], strides = [1, 1]} : vector<32x32xf32> to vector<16x32xf32>
    %62 = vector.extract_strided_slice %58 {offsets = [10, 0], sizes = [16, 32], strides = [1, 1]} : vector<32x32xf32> to vector<16x32xf32>
    %63 = tpu.concatenate %60, %61, %62 in 1 : vector<16x32xf32>, vector<16x32xf32>, vector<16x32xf32> -> vector<16x96xf32>
    %c1 = arith.constant 1 : index
    %c0_39 = arith.constant 0 : index
    %c0_40 = arith.constant 0 : index
    %64 = vector.load %arg6[%c1, %c0_39, %c0_40] : memref<2x96x64xf32, #tpu.memory_space<vmem>>, vector<1x96x64xf32>
    %65 = vector.shape_cast %64 : vector<1x96x64xf32> to vector<96x64xf32>
    %cst_41 = arith.constant dense<0.000000e+00> : vector<16x64xf32>
    %66 = tpu.matmul %63, %65, %cst_41 {dimension_numbers = #tpu.dot_dimension_numbers<[1], [0], [0], [1], [0, 0, 1, 1], [], []>} : vector<16x96xf32>, vector<96x64xf32>, vector<16x64xf32> -> vector<16x64xf32>
    %c1_42 = arith.constant 1 : index
    %c0_43 = arith.constant 0 : index
    %c0_44 = arith.constant 0 : index
    %67 = vector.load %arg7[%c1_42, %c0_43, %c0_44] : memref<2x1x64xf32, #tpu.memory_space<vmem>>, vector<1x1x64xf32>
    %68 = vector.shape_cast %67 : vector<1x1x64xf32> to vector<1x64xf32>
    %69 = vector.broadcast %68 : vector<1x64xf32> to vector<16x64xf32>
    %70 = arith.addf %66, %69 : vector<16x64xf32>
    %71 = vector.extract_strided_slice %70 {offsets = [0, 0], sizes = [16, 32], strides = [1, 1]} : vector<16x64xf32> to vector<16x32xf32>
    %72 = vector.extract_strided_slice %70 {offsets = [0, 32], sizes = [16, 32], strides = [1, 1]} : vector<16x64xf32> to vector<16x32xf32>
    %73 = arith.negf %72 : vector<16x32xf32>
    %74 = math.exp %73 : vector<16x32xf32>
    %cst_45 = arith.constant 1.000000e+00 : f32
    %75 = vector.broadcast %cst_45 : f32 to vector<16x32xf32>
    %76 = arith.addf %75, %74 : vector<16x32xf32>
    %77 = arith.divf %75, %76 : vector<16x32xf32>
    %78 = arith.mulf %71, %77 : vector<16x32xf32>
    %c1_46 = arith.constant 1 : index
    %c0_47 = arith.constant 0 : index
    %c0_48 = arith.constant 0 : index
    %79 = vector.load %arg8[%c1_46, %c0_47, %c0_48] : memref<2x32x32xf32, #tpu.memory_space<vmem>>, vector<1x32x32xf32>
    %80 = vector.shape_cast %79 : vector<1x32x32xf32> to vector<32x32xf32>
    %cst_49 = arith.constant dense<0.000000e+00> : vector<16x32xf32>
    %81 = tpu.matmul %78, %80, %cst_49 {dimension_numbers = #tpu.dot_dimension_numbers<[1], [0], [0], [1], [0, 0, 1, 1], [], []>} : vector<16x32xf32>, vector<32x32xf32>, vector<16x32xf32> -> vector<16x32xf32>
    %c1_50 = arith.constant 1 : index
    %c0_51 = arith.constant 0 : index
    %c0_52 = arith.constant 0 : index
    %82 = vector.load %arg9[%c1_50, %c0_51, %c0_52] : memref<2x1x32xf32, #tpu.memory_space<vmem>>, vector<1x1x32xf32>
    %83 = vector.shape_cast %82 : vector<1x1x32xf32> to vector<1x32xf32>
    %84 = vector.broadcast %83 : vector<1x32xf32> to vector<16x32xf32>
    %85 = arith.addf %81, %84 : vector<16x32xf32>
    %cst_53 = arith.constant 0.000000e+00 : f32
    %86 = vector.broadcast %cst_53 : f32 to vector<16x32xf32>
    %87 = arith.maximumf %85, %86 : vector<16x32xf32>
    %88 = vector.extract_strided_slice %15 {offsets = [1, 0], sizes = [1, 32], strides = [1, 1]} : vector<2x64xf32> to vector<1x32xf32>
    %89 = vector.extract_strided_slice %15 {offsets = [1, 32], sizes = [1, 32], strides = [1, 1]} : vector<2x64xf32> to vector<1x32xf32>
    %cst_54 = arith.constant 1.000000e+00 : f32
    %90 = vector.broadcast %cst_54 : f32 to vector<1x32xf32>
    %91 = arith.addf %88, %90 : vector<1x32xf32>
    %92 = vector.broadcast %91 : vector<1x32xf32> to vector<16x32xf32>
    %93 = arith.mulf %87, %92 : vector<16x32xf32>
    %94 = vector.broadcast %89 : vector<1x32xf32> to vector<16x32xf32>
    %95 = arith.addf %93, %94 : vector<16x32xf32>
    %96 = arith.addf %59, %95 : vector<16x32xf32>
    %97 = vector.broadcast %1 : vector<16x1xf32> to vector<16x32xf32>
    %98 = arith.mulf %96, %97 : vector<16x32xf32>
    %c8_55 = arith.constant 8 : index
    %c0_56 = arith.constant 0 : index
    %99 = vector.load %arg14[%c8_55, %c0_56] : memref<32x32xf32, #tpu.memory_space<vmem>>, vector<16x32xf32>
    tpu.vector_store %arg14[%c8_55, %c0_56], %98 {strides = array<i32>} : memref<32x32xf32, #tpu.memory_space<vmem>>, vector<16x32xf32>,
    %100 = vector.broadcast %1 : vector<16x1xf32> to vector<16x32xf32>
    %101 = arith.mulf %98, %100 : vector<16x32xf32>
    %c0_57 = arith.constant 0 : index
    %c0_58 = arith.constant 0 : index
    %c0_59 = arith.constant 0 : index
    %102 = vector.load %arg13[%c0_57, %c0_58, %c0_59] : memref<1x16x32xf32, #tpu.memory_space<vmem>>, vector<1x16x32xf32>
    %103 = vector.shape_cast %102 : vector<1x16x32xf32> to vector<16x32xf32>
    %104 = vector.shape_cast %101 : vector<16x32xf32> to vector<1x16x32xf32>
    tpu.vector_store %arg13[%c0_57, %c0_58, %c0_59], %104 {strides = array<i32>} : memref<1x16x32xf32, #tpu.memory_space<vmem>>, vector<1x16x32xf32>,
    %c0_60 = arith.constant 0 : index
    %c0_61 = arith.constant 0 : index
    %105 = vector.load %arg10[%c0_60, %c0_61] : memref<32x4xf32, #tpu.memory_space<vmem>>, vector<32x4xf32>
    %cst_62 = arith.constant dense<0.000000e+00> : vector<16x4xf32>
    %106 = tpu.matmul %98, %105, %cst_62 {dimension_numbers = #tpu.dot_dimension_numbers<[1], [0], [0], [1], [0, 0, 1, 1], [], []>} : vector<16x32xf32>, vector<32x4xf32>, vector<16x4xf32> -> vector<16x4xf32>
    %c0_63 = arith.constant 0 : index
    %c0_64 = arith.constant 0 : index
    %107 = vector.load %arg11[%c0_63, %c0_64] : memref<1x4xf32, #tpu.memory_space<vmem>>, vector<1x4xf32>
    %108 = vector.broadcast %107 : vector<1x4xf32> to vector<16x4xf32>
    %109 = arith.addf %106, %108 : vector<16x4xf32>
    %110 = vector.broadcast %1 : vector<16x1xf32> to vector<16x4xf32>
    %111 = arith.mulf %109, %110 : vector<16x4xf32>
    %c0_65 = arith.constant 0 : index
    %c0_66 = arith.constant 0 : index
    %c0_67 = arith.constant 0 : index
    %112 = vector.load %arg12[%c0_65, %c0_66, %c0_67] : memref<1x16x4xf32, #tpu.memory_space<vmem>>, vector<1x16x4xf32>
    %113 = vector.shape_cast %112 : vector<1x16x4xf32> to vector<16x4xf32>
    %114 = vector.shape_cast %111 : vector<16x4xf32> to vector<1x16x4xf32>
    tpu.vector_store %arg12[%c0_65, %c0_66, %c0_67], %114 {strides = array<i32>} : memref<1x16x4xf32, #tpu.memory_space<vmem>>, vector<1x16x4xf32>,
    return
  }
  func.func @transform_0(%arg0: i32) -> (i32, i32, i32) {
    %c0_i32 = arith.constant 0 : i32
    %c0_i32_0 = arith.constant 0 : i32
    %c0_i32_1 = arith.constant 0 : i32
    return %arg0, %c0_i32, %c0_i32_0 : i32, i32, i32
  }
  func.func @transform_1(%arg0: i32) -> (i32, i32, i32) {
    %c0_i32 = arith.constant 0 : i32
    %c0_i32_0 = arith.constant 0 : i32
    %c0_i32_1 = arith.constant 0 : i32
    return %arg0, %c0_i32, %c0_i32_0 : i32, i32, i32
  }
  func.func @transform_2(%arg0: i32) -> (i32, i32, i32) {
    %c0_i32 = arith.constant 0 : i32
    %c0_i32_0 = arith.constant 0 : i32
    %c0_i32_1 = arith.constant 0 : i32
    return %arg0, %c0_i32, %c0_i32_0 : i32, i32, i32
  }
  func.func @transform_3(%arg0: i32) -> (i32, i32) {
    %c0_i32 = arith.constant 0 : i32
    %c0_i32_0 = arith.constant 0 : i32
    %c0_i32_1 = arith.constant 0 : i32
    return %c0_i32, %c0_i32_0 : i32, i32
  }
  func.func @transform_4(%arg0: i32) -> (i32, i32) {
    %c0_i32 = arith.constant 0 : i32
    %c0_i32_0 = arith.constant 0 : i32
    %c0_i32_1 = arith.constant 0 : i32
    return %c0_i32, %c0_i32_0 : i32, i32
  }
  func.func @transform_5(%arg0: i32) -> (i32, i32, i32) {
    %c0_i32 = arith.constant 0 : i32
    %c0_i32_0 = arith.constant 0 : i32
    %c0_i32_1 = arith.constant 0 : i32
    %c0_i32_2 = arith.constant 0 : i32
    return %c0_i32, %c0_i32_0, %c0_i32_1 : i32, i32, i32
  }
  func.func @transform_6(%arg0: i32) -> (i32, i32, i32) {
    %c0_i32 = arith.constant 0 : i32
    %c0_i32_0 = arith.constant 0 : i32
    %c0_i32_1 = arith.constant 0 : i32
    %c0_i32_2 = arith.constant 0 : i32
    return %c0_i32, %c0_i32_0, %c0_i32_1 : i32, i32, i32
  }
  func.func @transform_7(%arg0: i32) -> (i32, i32, i32) {
    %c0_i32 = arith.constant 0 : i32
    %c0_i32_0 = arith.constant 0 : i32
    %c0_i32_1 = arith.constant 0 : i32
    %c0_i32_2 = arith.constant 0 : i32
    return %c0_i32, %c0_i32_0, %c0_i32_1 : i32, i32, i32
  }
  func.func @transform_8(%arg0: i32) -> (i32, i32, i32) {
    %c0_i32 = arith.constant 0 : i32
    %c0_i32_0 = arith.constant 0 : i32
    %c0_i32_1 = arith.constant 0 : i32
    %c0_i32_2 = arith.constant 0 : i32
    return %c0_i32, %c0_i32_0, %c0_i32_1 : i32, i32, i32
  }
  func.func @transform_9(%arg0: i32) -> (i32, i32) {
    %c0_i32 = arith.constant 0 : i32
    %c0_i32_0 = arith.constant 0 : i32
    %c0_i32_1 = arith.constant 0 : i32
    return %c0_i32, %c0_i32_0 : i32, i32
  }
  func.func @transform_10(%arg0: i32) -> (i32, i32) {
    %c0_i32 = arith.constant 0 : i32
    %c0_i32_0 = arith.constant 0 : i32
    %c0_i32_1 = arith.constant 0 : i32
    return %c0_i32, %c0_i32_0 : i32, i32
  }
  func.func @transform_11(%arg0: i32) -> (i32, i32, i32) {
    %c0_i32 = arith.constant 0 : i32
    %c0_i32_0 = arith.constant 0 : i32
    %c0_i32_1 = arith.constant 0 : i32
    return %arg0, %c0_i32, %c0_i32_0 : i32, i32, i32
  }
  func.func @transform_12(%arg0: i32) -> (i32, i32, i32) {
    %c0_i32 = arith.constant 0 : i32
    %c0_i32_0 = arith.constant 0 : i32
    %c0_i32_1 = arith.constant 0 : i32
    return %arg0, %c0_i32, %c0_i32_0 : i32, i32, i32
  }
}

module attributes {stable_mosaic.version = 11 : i64} {
  func.func @kern(%arg0: i32, %arg1: memref<1x16x4xf32, #tpu.memory_space<vmem>>, %arg2: memref<1x16x1xf32, #tpu.memory_space<vmem>>, %arg3: memref<1x2x64xf32, #tpu.memory_space<vmem>>, %arg4: memref<4x32xf32, #tpu.memory_space<vmem>>, %arg5: memref<1x32xf32, #tpu.memory_space<vmem>>, %arg6: memref<2x96x64xf32, #tpu.memory_space<vmem>>, %arg7: memref<2x1x64xf32, #tpu.memory_space<vmem>>, %arg8: memref<2x32x32xf32, #tpu.memory_space<vmem>>, %arg9: memref<2x1x32xf32, #tpu.memory_space<vmem>>, %arg10: memref<32x4xf32, #tpu.memory_space<vmem>>, %arg11: memref<1x4xf32, #tpu.memory_space<vmem>>, %arg12: memref<1x16x4xf32, #tpu.memory_space<vmem>>, %arg13: memref<1x16x32xf32, #tpu.memory_space<vmem>>, %arg14: memref<32x32xf32, #tpu.memory_space<vmem>>) attributes {dimension_semantics = [#tpu.dimension_semantics<parallel>], iteration_bounds = array<i64: 2>, scalar_prefetch = 0 : i64, scratch_operands = 1 : i64, tpu.core_type = #tpu.core_type<tc>, window_params = [{transform_indices = @transform_0, window_bounds = array<i64: 1, 16, 4>}, {transform_indices = @transform_1, window_bounds = array<i64: 1, 16, 1>}, {transform_indices = @transform_2, window_bounds = array<i64: 1, 2, 64>}, {pipeline_mode = #tpu.pipeline_mode<synchronous>, transform_indices = @transform_3, window_bounds = array<i64: 4, 32>}, {pipeline_mode = #tpu.pipeline_mode<synchronous>, transform_indices = @transform_4, window_bounds = array<i64: 1, 32>}, {pipeline_mode = #tpu.pipeline_mode<synchronous>, transform_indices = @transform_5, window_bounds = array<i64: 2, 96, 64>}, {pipeline_mode = #tpu.pipeline_mode<synchronous>, transform_indices = @transform_6, window_bounds = array<i64: 2, 1, 64>}, {pipeline_mode = #tpu.pipeline_mode<synchronous>, transform_indices = @transform_7, window_bounds = array<i64: 2, 32, 32>}, {pipeline_mode = #tpu.pipeline_mode<synchronous>, transform_indices = @transform_8, window_bounds = array<i64: 2, 1, 32>}, {pipeline_mode = #tpu.pipeline_mode<synchronous>, transform_indices = @transform_9, window_bounds = array<i64: 32, 4>}, {pipeline_mode = #tpu.pipeline_mode<synchronous>, transform_indices = @transform_10, window_bounds = array<i64: 1, 4>}, {transform_indices = @transform_11, window_bounds = array<i64: 1, 16, 4>}, {transform_indices = @transform_12, window_bounds = array<i64: 1, 16, 32>}]} {
    %c0 = arith.constant 0 : index
    %c0_0 = arith.constant 0 : index
    %c0_1 = arith.constant 0 : index
    %0 = vector.load %arg2[%c0, %c0_0, %c0_1] : memref<1x16x1xf32, #tpu.memory_space<vmem>>, vector<1x16x1xf32>
    %1 = vector.shape_cast %0 : vector<1x16x1xf32> to vector<16x1xf32>
    %c0_2 = arith.constant 0 : index
    %c0_3 = arith.constant 0 : index
    %c0_4 = arith.constant 0 : index
    %2 = vector.load %arg1[%c0_2, %c0_3, %c0_4] : memref<1x16x4xf32, #tpu.memory_space<vmem>>, vector<1x16x4xf32>
    %3 = vector.shape_cast %2 : vector<1x16x4xf32> to vector<16x4xf32>
    %cst = arith.constant dense<0xFF800000> : vector<16xf32>
    %4 = vector.multi_reduction <maximumf>, %3, %cst [1] : vector<16x4xf32> to vector<16xf32>
    %5 = vector.shape_cast %4 : vector<16xf32> to vector<16x1xf32>
    %6 = vector.broadcast %5 : vector<16x1xf32> to vector<16x4xf32>
    %7 = arith.subf %3, %6 : vector<16x4xf32>
    %8 = math.exp %7 : vector<16x4xf32>
    %cst_5 = arith.constant dense<0.000000e+00> : vector<16xf32>
    %9 = vector.multi_reduction <add>, %8, %cst_5 [1] : vector<16x4xf32> to vector<16xf32>
    %10 = vector.shape_cast %9 : vector<16xf32> to vector<16x1xf32>
    %11 = tpu.reciprocal %10 : vector<16x1xf32> -> vector<16x1xf32>
    %12 = vector.broadcast %11 : vector<16x1xf32> to vector<16x4xf32>
    %13 = arith.mulf %8, %12 : vector<16x4xf32>
    %14 = vector.broadcast %1 : vector<16x1xf32> to vector<16x4xf32>
    %15 = arith.mulf %13, %14 : vector<16x4xf32>
    %c0_6 = arith.constant 0 : index
    %c0_7 = arith.constant 0 : index
    %16 = vector.load %arg4[%c0_6, %c0_7] : memref<4x32xf32, #tpu.memory_space<vmem>>, vector<4x32xf32>
    %cst_8 = arith.constant dense<0.000000e+00> : vector<16x32xf32>
    %17 = tpu.matmul %15, %16, %cst_8 {dimension_numbers = #tpu.dot_dimension_numbers<[1], [0], [0], [1], [0, 0, 1, 1], [], []>} : vector<16x4xf32>, vector<4x32xf32>, vector<16x32xf32> -> vector<16x32xf32>
    %c0_9 = arith.constant 0 : index
    %c0_10 = arith.constant 0 : index
    %18 = vector.load %arg5[%c0_9, %c0_10] : memref<1x32xf32, #tpu.memory_space<vmem>>, vector<1x32xf32>
    %19 = vector.broadcast %18 : vector<1x32xf32> to vector<16x32xf32>
    %20 = arith.addf %17, %19 : vector<16x32xf32>
    %21 = vector.broadcast %1 : vector<16x1xf32> to vector<16x32xf32>
    %22 = arith.mulf %20, %21 : vector<16x32xf32>
    %cst_11 = arith.constant 0.000000e+00 : f32
    %23 = vector.broadcast %cst_11 : f32 to vector<32x32xf32>
    %c0_12 = arith.constant 0 : index
    %c0_13 = arith.constant 0 : index
    %24 = vector.load %arg14[%c0_12, %c0_13] : memref<32x32xf32, #tpu.memory_space<vmem>>, vector<32x32xf32>
    tpu.vector_store %arg14[%c0_12, %c0_13], %23 {strides = array<i32>} : memref<32x32xf32, #tpu.memory_space<vmem>>, vector<32x32xf32>,
    %c8 = arith.constant 8 : index
    %c0_14 = arith.constant 0 : index
    %25 = vector.load %arg14[%c8, %c0_14] : memref<32x32xf32, #tpu.memory_space<vmem>>, vector<16x32xf32>
    tpu.vector_store %arg14[%c8, %c0_14], %22 {strides = array<i32>} : memref<32x32xf32, #tpu.memory_space<vmem>>, vector<16x32xf32>,
    %c0_15 = arith.constant 0 : index
    %c0_16 = arith.constant 0 : index
    %c0_17 = arith.constant 0 : index
    %26 = vector.load %arg3[%c0_15, %c0_16, %c0_17] : memref<1x2x64xf32, #tpu.memory_space<vmem>>, vector<1x2x64xf32>
    %27 = vector.shape_cast %26 : vector<1x2x64xf32> to vector<2x64xf32>
    %c0_18 = arith.constant 0 : index
    %c0_19 = arith.constant 0 : index
    %28 = vector.load %arg14[%c0_18, %c0_19] : memref<32x32xf32, #tpu.memory_space<vmem>>, vector<32x32xf32>
    %29 = vector.extract_strided_slice %28 {offsets = [8, 0], sizes = [16, 32], strides = [1, 1]} : vector<32x32xf32> to vector<16x32xf32>
    %30 = vector.extract_strided_slice %28 {offsets = [7, 0], sizes = [16, 32], strides = [1, 1]} : vector<32x32xf32> to vector<16x32xf32>
    %31 = vector.extract_strided_slice %28 {offsets = [8, 0], sizes = [16, 32], strides = [1, 1]} : vector<32x32xf32> to vector<16x32xf32>
    %32 = vector.extract_strided_slice %28 {offsets = [9, 0], sizes = [16, 32], strides = [1, 1]} : vector<32x32xf32> to vector<16x32xf32>
    %33 = tpu.concatenate %30, %31, %32 in 1 : vector<16x32xf32>, vector<16x32xf32>, vector<16x32xf32> -> vector<16x96xf32>
    %c0_20 = arith.constant 0 : index
    %c0_21 = arith.constant 0 : index
    %c0_22 = arith.constant 0 : index
    %34 = vector.load %arg6[%c0_20, %c0_21, %c0_22] : memref<2x96x64xf32, #tpu.memory_space<vmem>>, vector<1x96x64xf32>
    %35 = vector.shape_cast %34 : vector<1x96x64xf32> to vector<96x64xf32>
    %cst_23 = arith.constant dense<0.000000e+00> : vector<16x64xf32>
    %36 = tpu.matmul %33, %35, %cst_23 {dimension_numbers = #tpu.dot_dimension_numbers<[1], [0], [0], [1], [0, 0, 1, 1], [], []>} : vector<16x96xf32>, vector<96x64xf32>, vector<16x64xf32> -> vector<16x64xf32>
    %c0_24 = arith.constant 0 : index
    %c0_25 = arith.constant 0 : index
    %c0_26 = arith.constant 0 : index
    %37 = vector.load %arg7[%c0_24, %c0_25, %c0_26] : memref<2x1x64xf32, #tpu.memory_space<vmem>>, vector<1x1x64xf32>
    %38 = vector.shape_cast %37 : vector<1x1x64xf32> to vector<1x64xf32>
    %39 = vector.broadcast %38 : vector<1x64xf32> to vector<16x64xf32>
    %40 = arith.addf %36, %39 : vector<16x64xf32>
    %41 = vector.extract_strided_slice %40 {offsets = [0, 0], sizes = [16, 32], strides = [1, 1]} : vector<16x64xf32> to vector<16x32xf32>
    %42 = vector.extract_strided_slice %40 {offsets = [0, 32], sizes = [16, 32], strides = [1, 1]} : vector<16x64xf32> to vector<16x32xf32>
    %43 = arith.negf %42 : vector<16x32xf32>
    %44 = math.exp %43 : vector<16x32xf32>
    %cst_27 = arith.constant 1.000000e+00 : f32
    %45 = vector.broadcast %cst_27 : f32 to vector<16x32xf32>
    %46 = arith.addf %45, %44 : vector<16x32xf32>
    %47 = arith.divf %45, %46 : vector<16x32xf32>
    %48 = arith.mulf %41, %47 : vector<16x32xf32>
    %c0_28 = arith.constant 0 : index
    %c0_29 = arith.constant 0 : index
    %c0_30 = arith.constant 0 : index
    %49 = vector.load %arg8[%c0_28, %c0_29, %c0_30] : memref<2x32x32xf32, #tpu.memory_space<vmem>>, vector<1x32x32xf32>
    %50 = vector.shape_cast %49 : vector<1x32x32xf32> to vector<32x32xf32>
    %cst_31 = arith.constant dense<0.000000e+00> : vector<16x32xf32>
    %51 = tpu.matmul %48, %50, %cst_31 {dimension_numbers = #tpu.dot_dimension_numbers<[1], [0], [0], [1], [0, 0, 1, 1], [], []>} : vector<16x32xf32>, vector<32x32xf32>, vector<16x32xf32> -> vector<16x32xf32>
    %c0_32 = arith.constant 0 : index
    %c0_33 = arith.constant 0 : index
    %c0_34 = arith.constant 0 : index
    %52 = vector.load %arg9[%c0_32, %c0_33, %c0_34] : memref<2x1x32xf32, #tpu.memory_space<vmem>>, vector<1x1x32xf32>
    %53 = vector.shape_cast %52 : vector<1x1x32xf32> to vector<1x32xf32>
    %54 = vector.broadcast %53 : vector<1x32xf32> to vector<16x32xf32>
    %55 = arith.addf %51, %54 : vector<16x32xf32>
    %cst_35 = arith.constant 0.000000e+00 : f32
    %56 = vector.broadcast %cst_35 : f32 to vector<16x32xf32>
    %57 = arith.maximumf %55, %56 : vector<16x32xf32>
    %58 = vector.extract_strided_slice %27 {offsets = [0, 0], sizes = [1, 32], strides = [1, 1]} : vector<2x64xf32> to vector<1x32xf32>
    %59 = vector.extract_strided_slice %27 {offsets = [0, 32], sizes = [1, 32], strides = [1, 1]} : vector<2x64xf32> to vector<1x32xf32>
    %cst_36 = arith.constant 1.000000e+00 : f32
    %60 = vector.broadcast %cst_36 : f32 to vector<1x32xf32>
    %61 = arith.addf %58, %60 : vector<1x32xf32>
    %62 = vector.broadcast %61 : vector<1x32xf32> to vector<16x32xf32>
    %63 = arith.mulf %57, %62 : vector<16x32xf32>
    %64 = vector.broadcast %59 : vector<1x32xf32> to vector<16x32xf32>
    %65 = arith.addf %63, %64 : vector<16x32xf32>
    %66 = arith.addf %29, %65 : vector<16x32xf32>
    %67 = vector.broadcast %1 : vector<16x1xf32> to vector<16x32xf32>
    %68 = arith.mulf %66, %67 : vector<16x32xf32>
    %c8_37 = arith.constant 8 : index
    %c0_38 = arith.constant 0 : index
    %69 = vector.load %arg14[%c8_37, %c0_38] : memref<32x32xf32, #tpu.memory_space<vmem>>, vector<16x32xf32>
    tpu.vector_store %arg14[%c8_37, %c0_38], %68 {strides = array<i32>} : memref<32x32xf32, #tpu.memory_space<vmem>>, vector<16x32xf32>,
    %c0_39 = arith.constant 0 : index
    %c0_40 = arith.constant 0 : index
    %70 = vector.load %arg14[%c0_39, %c0_40] : memref<32x32xf32, #tpu.memory_space<vmem>>, vector<32x32xf32>
    %71 = vector.extract_strided_slice %70 {offsets = [8, 0], sizes = [16, 32], strides = [1, 1]} : vector<32x32xf32> to vector<16x32xf32>
    %72 = vector.extract_strided_slice %70 {offsets = [6, 0], sizes = [16, 32], strides = [1, 1]} : vector<32x32xf32> to vector<16x32xf32>
    %73 = vector.extract_strided_slice %70 {offsets = [8, 0], sizes = [16, 32], strides = [1, 1]} : vector<32x32xf32> to vector<16x32xf32>
    %74 = vector.extract_strided_slice %70 {offsets = [10, 0], sizes = [16, 32], strides = [1, 1]} : vector<32x32xf32> to vector<16x32xf32>
    %75 = tpu.concatenate %72, %73, %74 in 1 : vector<16x32xf32>, vector<16x32xf32>, vector<16x32xf32> -> vector<16x96xf32>
    %c1 = arith.constant 1 : index
    %c0_41 = arith.constant 0 : index
    %c0_42 = arith.constant 0 : index
    %76 = vector.load %arg6[%c1, %c0_41, %c0_42] : memref<2x96x64xf32, #tpu.memory_space<vmem>>, vector<1x96x64xf32>
    %77 = vector.shape_cast %76 : vector<1x96x64xf32> to vector<96x64xf32>
    %cst_43 = arith.constant dense<0.000000e+00> : vector<16x64xf32>
    %78 = tpu.matmul %75, %77, %cst_43 {dimension_numbers = #tpu.dot_dimension_numbers<[1], [0], [0], [1], [0, 0, 1, 1], [], []>} : vector<16x96xf32>, vector<96x64xf32>, vector<16x64xf32> -> vector<16x64xf32>
    %c1_44 = arith.constant 1 : index
    %c0_45 = arith.constant 0 : index
    %c0_46 = arith.constant 0 : index
    %79 = vector.load %arg7[%c1_44, %c0_45, %c0_46] : memref<2x1x64xf32, #tpu.memory_space<vmem>>, vector<1x1x64xf32>
    %80 = vector.shape_cast %79 : vector<1x1x64xf32> to vector<1x64xf32>
    %81 = vector.broadcast %80 : vector<1x64xf32> to vector<16x64xf32>
    %82 = arith.addf %78, %81 : vector<16x64xf32>
    %83 = vector.extract_strided_slice %82 {offsets = [0, 0], sizes = [16, 32], strides = [1, 1]} : vector<16x64xf32> to vector<16x32xf32>
    %84 = vector.extract_strided_slice %82 {offsets = [0, 32], sizes = [16, 32], strides = [1, 1]} : vector<16x64xf32> to vector<16x32xf32>
    %85 = arith.negf %84 : vector<16x32xf32>
    %86 = math.exp %85 : vector<16x32xf32>
    %cst_47 = arith.constant 1.000000e+00 : f32
    %87 = vector.broadcast %cst_47 : f32 to vector<16x32xf32>
    %88 = arith.addf %87, %86 : vector<16x32xf32>
    %89 = arith.divf %87, %88 : vector<16x32xf32>
    %90 = arith.mulf %83, %89 : vector<16x32xf32>
    %c1_48 = arith.constant 1 : index
    %c0_49 = arith.constant 0 : index
    %c0_50 = arith.constant 0 : index
    %91 = vector.load %arg8[%c1_48, %c0_49, %c0_50] : memref<2x32x32xf32, #tpu.memory_space<vmem>>, vector<1x32x32xf32>
    %92 = vector.shape_cast %91 : vector<1x32x32xf32> to vector<32x32xf32>
    %cst_51 = arith.constant dense<0.000000e+00> : vector<16x32xf32>
    %93 = tpu.matmul %90, %92, %cst_51 {dimension_numbers = #tpu.dot_dimension_numbers<[1], [0], [0], [1], [0, 0, 1, 1], [], []>} : vector<16x32xf32>, vector<32x32xf32>, vector<16x32xf32> -> vector<16x32xf32>
    %c1_52 = arith.constant 1 : index
    %c0_53 = arith.constant 0 : index
    %c0_54 = arith.constant 0 : index
    %94 = vector.load %arg9[%c1_52, %c0_53, %c0_54] : memref<2x1x32xf32, #tpu.memory_space<vmem>>, vector<1x1x32xf32>
    %95 = vector.shape_cast %94 : vector<1x1x32xf32> to vector<1x32xf32>
    %96 = vector.broadcast %95 : vector<1x32xf32> to vector<16x32xf32>
    %97 = arith.addf %93, %96 : vector<16x32xf32>
    %cst_55 = arith.constant 0.000000e+00 : f32
    %98 = vector.broadcast %cst_55 : f32 to vector<16x32xf32>
    %99 = arith.maximumf %97, %98 : vector<16x32xf32>
    %100 = vector.extract_strided_slice %27 {offsets = [1, 0], sizes = [1, 32], strides = [1, 1]} : vector<2x64xf32> to vector<1x32xf32>
    %101 = vector.extract_strided_slice %27 {offsets = [1, 32], sizes = [1, 32], strides = [1, 1]} : vector<2x64xf32> to vector<1x32xf32>
    %cst_56 = arith.constant 1.000000e+00 : f32
    %102 = vector.broadcast %cst_56 : f32 to vector<1x32xf32>
    %103 = arith.addf %100, %102 : vector<1x32xf32>
    %104 = vector.broadcast %103 : vector<1x32xf32> to vector<16x32xf32>
    %105 = arith.mulf %99, %104 : vector<16x32xf32>
    %106 = vector.broadcast %101 : vector<1x32xf32> to vector<16x32xf32>
    %107 = arith.addf %105, %106 : vector<16x32xf32>
    %108 = arith.addf %71, %107 : vector<16x32xf32>
    %109 = vector.broadcast %1 : vector<16x1xf32> to vector<16x32xf32>
    %110 = arith.mulf %108, %109 : vector<16x32xf32>
    %c8_57 = arith.constant 8 : index
    %c0_58 = arith.constant 0 : index
    %111 = vector.load %arg14[%c8_57, %c0_58] : memref<32x32xf32, #tpu.memory_space<vmem>>, vector<16x32xf32>
    tpu.vector_store %arg14[%c8_57, %c0_58], %110 {strides = array<i32>} : memref<32x32xf32, #tpu.memory_space<vmem>>, vector<16x32xf32>,
    %112 = vector.broadcast %1 : vector<16x1xf32> to vector<16x32xf32>
    %113 = arith.mulf %110, %112 : vector<16x32xf32>
    %c0_59 = arith.constant 0 : index
    %c0_60 = arith.constant 0 : index
    %c0_61 = arith.constant 0 : index
    %114 = vector.load %arg13[%c0_59, %c0_60, %c0_61] : memref<1x16x32xf32, #tpu.memory_space<vmem>>, vector<1x16x32xf32>
    %115 = vector.shape_cast %114 : vector<1x16x32xf32> to vector<16x32xf32>
    %116 = vector.shape_cast %113 : vector<16x32xf32> to vector<1x16x32xf32>
    tpu.vector_store %arg13[%c0_59, %c0_60, %c0_61], %116 {strides = array<i32>} : memref<1x16x32xf32, #tpu.memory_space<vmem>>, vector<1x16x32xf32>,
    %c0_62 = arith.constant 0 : index
    %c0_63 = arith.constant 0 : index
    %117 = vector.load %arg10[%c0_62, %c0_63] : memref<32x4xf32, #tpu.memory_space<vmem>>, vector<32x4xf32>
    %cst_64 = arith.constant dense<0.000000e+00> : vector<16x4xf32>
    %118 = tpu.matmul %110, %117, %cst_64 {dimension_numbers = #tpu.dot_dimension_numbers<[1], [0], [0], [1], [0, 0, 1, 1], [], []>} : vector<16x32xf32>, vector<32x4xf32>, vector<16x4xf32> -> vector<16x4xf32>
    %c0_65 = arith.constant 0 : index
    %c0_66 = arith.constant 0 : index
    %119 = vector.load %arg11[%c0_65, %c0_66] : memref<1x4xf32, #tpu.memory_space<vmem>>, vector<1x4xf32>
    %120 = vector.broadcast %119 : vector<1x4xf32> to vector<16x4xf32>
    %121 = arith.addf %118, %120 : vector<16x4xf32>
    %122 = vector.broadcast %1 : vector<16x1xf32> to vector<16x4xf32>
    %123 = arith.mulf %121, %122 : vector<16x4xf32>
    %c0_67 = arith.constant 0 : index
    %c0_68 = arith.constant 0 : index
    %c0_69 = arith.constant 0 : index
    %124 = vector.load %arg12[%c0_67, %c0_68, %c0_69] : memref<1x16x4xf32, #tpu.memory_space<vmem>>, vector<1x16x4xf32>
    %125 = vector.shape_cast %124 : vector<1x16x4xf32> to vector<16x4xf32>
    %126 = vector.shape_cast %123 : vector<16x4xf32> to vector<1x16x4xf32>
    tpu.vector_store %arg12[%c0_67, %c0_68, %c0_69], %126 {strides = array<i32>} : memref<1x16x4xf32, #tpu.memory_space<vmem>>, vector<1x16x4xf32>,
    return
  }
  func.func @transform_0(%arg0: i32) -> (i32, i32, i32) {
    %c0_i32 = arith.constant 0 : i32
    %c0_i32_0 = arith.constant 0 : i32
    %c0_i32_1 = arith.constant 0 : i32
    return %arg0, %c0_i32, %c0_i32_0 : i32, i32, i32
  }
  func.func @transform_1(%arg0: i32) -> (i32, i32, i32) {
    %c0_i32 = arith.constant 0 : i32
    %c0_i32_0 = arith.constant 0 : i32
    %c0_i32_1 = arith.constant 0 : i32
    return %arg0, %c0_i32, %c0_i32_0 : i32, i32, i32
  }
  func.func @transform_2(%arg0: i32) -> (i32, i32, i32) {
    %c0_i32 = arith.constant 0 : i32
    %c0_i32_0 = arith.constant 0 : i32
    %c0_i32_1 = arith.constant 0 : i32
    return %arg0, %c0_i32, %c0_i32_0 : i32, i32, i32
  }
  func.func @transform_3(%arg0: i32) -> (i32, i32) {
    %c0_i32 = arith.constant 0 : i32
    %c0_i32_0 = arith.constant 0 : i32
    %c0_i32_1 = arith.constant 0 : i32
    return %c0_i32, %c0_i32_0 : i32, i32
  }
  func.func @transform_4(%arg0: i32) -> (i32, i32) {
    %c0_i32 = arith.constant 0 : i32
    %c0_i32_0 = arith.constant 0 : i32
    %c0_i32_1 = arith.constant 0 : i32
    return %c0_i32, %c0_i32_0 : i32, i32
  }
  func.func @transform_5(%arg0: i32) -> (i32, i32, i32) {
    %c0_i32 = arith.constant 0 : i32
    %c0_i32_0 = arith.constant 0 : i32
    %c0_i32_1 = arith.constant 0 : i32
    %c0_i32_2 = arith.constant 0 : i32
    return %c0_i32, %c0_i32_0, %c0_i32_1 : i32, i32, i32
  }
  func.func @transform_6(%arg0: i32) -> (i32, i32, i32) {
    %c0_i32 = arith.constant 0 : i32
    %c0_i32_0 = arith.constant 0 : i32
    %c0_i32_1 = arith.constant 0 : i32
    %c0_i32_2 = arith.constant 0 : i32
    return %c0_i32, %c0_i32_0, %c0_i32_1 : i32, i32, i32
  }
  func.func @transform_7(%arg0: i32) -> (i32, i32, i32) {
    %c0_i32 = arith.constant 0 : i32
    %c0_i32_0 = arith.constant 0 : i32
    %c0_i32_1 = arith.constant 0 : i32
    %c0_i32_2 = arith.constant 0 : i32
    return %c0_i32, %c0_i32_0, %c0_i32_1 : i32, i32, i32
  }
  func.func @transform_8(%arg0: i32) -> (i32, i32, i32) {
    %c0_i32 = arith.constant 0 : i32
    %c0_i32_0 = arith.constant 0 : i32
    %c0_i32_1 = arith.constant 0 : i32
    %c0_i32_2 = arith.constant 0 : i32
    return %c0_i32, %c0_i32_0, %c0_i32_1 : i32, i32, i32
  }
  func.func @transform_9(%arg0: i32) -> (i32, i32) {
    %c0_i32 = arith.constant 0 : i32
    %c0_i32_0 = arith.constant 0 : i32
    %c0_i32_1 = arith.constant 0 : i32
    return %c0_i32, %c0_i32_0 : i32, i32
  }
  func.func @transform_10(%arg0: i32) -> (i32, i32) {
    %c0_i32 = arith.constant 0 : i32
    %c0_i32_0 = arith.constant 0 : i32
    %c0_i32_1 = arith.constant 0 : i32
    return %c0_i32, %c0_i32_0 : i32, i32
  }
  func.func @transform_11(%arg0: i32) -> (i32, i32, i32) {
    %c0_i32 = arith.constant 0 : i32
    %c0_i32_0 = arith.constant 0 : i32
    %c0_i32_1 = arith.constant 0 : i32
    return %arg0, %c0_i32, %c0_i32_0 : i32, i32, i32
  }
  func.func @transform_12(%arg0: i32) -> (i32, i32, i32) {
    %c0_i32 = arith.constant 0 : i32
    %c0_i32_0 = arith.constant 0 : i32
    %c0_i32_1 = arith.constant 0 : i32
    return %arg0, %c0_i32, %c0_i32_0 : i32, i32, i32
  }
}

</mosaic_0001>

<bundles_post_ra>
// kernel: diff_multi_stage_forward.3
= control target key start
LH: loop header
LB: loop body
LE: loop exit
PB: predicated region body
PF: predicated region fallthrough
CT: control target
= control target key end

     0   :  { %s2201_s0 = inlined_call_operand.vmem [shape: f32[2,16,4], index: 0, kind: input, shape index: {}]   ;;  %s2202_s1 = inlined_call_operand.vmem [shape: f32[2,16,1], index: 1, kind: input, shape index: {}]   ;;  %s2203_s2 = inlined_call_operand.vmem [shape: f32[2,2,64], index: 2, kind: input, shape index: {}]   ;;  %s2204_s3 = inlined_call_operand.vmem [shape: f32[4,32], index: 3, kind: input, shape index: {}]   ;;  %s2205_s4 = inlined_call_operand.vmem [shape: f32[1,32], index: 4, kind: input, shape index: {}]   ;;  %s2206_s5 = inlined_call_operand.vmem [shape: f32[2,96,64], index: 5, kind: input, shape index: {}]   ;;  %s2207_s6 = inlined_call_operand.vmem [shape: f32[2,1,64], index: 6, kind: input, shape index: {}]   ;;  %s2208_s7 = inlined_call_operand.vmem [shape: f32[2,32,32], index: 7, kind: input, shape index: {}]   ;;  %s2209_s8 = inlined_call_operand.vmem [shape: f32[2,1,32], index: 8, kind: input, shape index: {}]   ;;  %s2210_s9 = inlined_call_operand.vmem [shape: f32[32,4], index: 9, kind: input, shape index: {}]   ;;  %s2211_s10 = inlined_call_operand.vmem [shape: f32[1,4], index: 10, kind: input, shape index: {}]   ;;  %s2212_s11 = inlined_call_operand.vmem [shape: f32[2,16,4], index: 11, kind: output, shape index: {0}]   ;;  %s2213_s12 = inlined_call_operand.hbm [shape: f32[2,16,32], index: 12, kind: output, shape index: {1}]  }
   0x1   :  { %2218 = sst [smem:[#allocation6_spill]] %s2201_s0 }
   0x2   :  { %2219 = sst [smem:[#allocation7_spill]] %s2202_s1 }
   0x3   :  { %2220 = sst [smem:[#allocation8_spill]] %s2203_s2 }
   0x4   :  { %18 = vsyncpa [#allocation4], 0 }
   0x5   :  { %20 = vsyncpa [#allocation4 + $0x1], 0  ;;  %s1824_s21 = smov 0   ;;  %s1826_s22 = smov 0  }
   0x6   :  { %s1828_s23 = smov 0   ;;  %s1830_s24 = smov 0  }
   0x7 LB: > { %s1845_s25 = sadd.s32 4294967295, %s1749_s24   ;;  %s1414_s26 = sadd.s32 4294967294, %s1749_s24   ;;  %s1749_s24 = sphi %s1830_s24, %s2231_s24   ;;  %s1745_s23 = sphi %s1828_s23, %s2230_s23   ;;  %s1741_s22 = sphi %s1826_s22, %s2229_s22   ;;  %s1737_s21 = sphi %s1824_s21, %s2228_s21  }
   0x8   : > { %s1849_s27 = sadd.s32 1, %s1749_s24   ;;  %s305_s28 = sadd.s32 1, %s1745_s23 }
   0x9   : > { %s302_s29 = ssub.s32 %s1749_s24, %s1849_s27  ;;  %p315_p0 = scmp.ne.s32.totalorder %s1745_s23, %s1741_s22 }
   0xa   : > { %p303_p1 = scmp.eq.s32.totalorder %s302_s29, 0  ;;  %p316_p2 = scmp.eq.s32.totalorder %s1845_s25, 1 }
   0xb   : > { %p321_p3 = scmp.ne.s32.totalorder %s1741_s22, %s1737_s21  ;;  %p322_p4 = scmp.eq.s32.totalorder %s1414_s26, 1 }
   0xc   : > { %s1860_s30 = scalar_select %p303_p1, %s1745_s23, %s305_s28  }
   0xd   : > { %p1862_p5 = por %p316_p2, %p315_p0  ;;  %p1866_p6 = por %p322_p4, %p321_p3 }
   0xe   : > { %p1417_p7 = scmp.ge.s32.totalorder %s1749_s24, 1  ;;  %p387_p8 = scmp.lt.s32.totalorder %s1749_s24, 3 }
  0x10   : > { %p388_p9 = pnand %p1417_p7, %p387_p8 }
  0x11   : > { %p443_p10 = scmp.lt.s32.totalorder (!%p388_p9), %s1845_s25, 1  ;;  %s2223_s0 = sld [smem:[#allocation6_spill]] (!%p388_p9) }
  0x12   : > { %391 = sbr.rel (%p388_p9) target bundleno = 2138 (0x85a), region = 64  ;;  %s2224_s1 = sld [smem:[#allocation7_spill]] (!%p388_p9) }
  0x13   : > { %s2216_s26 = smov (!%p388_p9), 32   ;;  %s2214_s20 = smov (!%p388_p9), 64  }
  0x14   : > { %s2225_s2 = sld [smem:[#allocation8_spill]] (!%p388_p9)  ;;  %s1755_s29 = smov (!%p388_p9), 96  }
  0x15   : > { %s2227_s17 = smov (!%p388_p9), 64  }
  0x17   : > { %s1874_s15 = scalar_select %p443_p10, %s1845_s25, 1  ;;  %vm466_vm0 = vcmask 31744   ;;  %v1751_v4 = vmov 0   ;;  %v501_v17 = vld [vmem:[%s2204_s3] sm:$0xf]  ;;  %vm515_vm1 = vcmask 1043456  }
  0x18   : > { %1663 = vset.pattern.permute.xlu0 %v1751_v4  ;;  %1664 = vset.pattern.permute.xlu1 %v1751_v4  ;;  %vm596_vm2 = vcmask 261120   ;;  %v1752_v28 = vmov 0.0   ;;  %v1426_v29 = vld [vmem:[%s2205_s4] ss:$0 sm:$0xff]  ;;  %v657_v32 = vld [vmem:[%s2206_s5 + $0x58] sm:$0xff]  ;;  %v656_v34 = vld [vmem:[%s2206_s5 + $0x50] sm:$0xff] }
  0x19   : > { %s1877_s16 = sshll.u32 %s1874_s15, 4  ;;  %1525 = vmatprep.subr.msk.mxu0 %vm515_vm1, %v501_v17  ;;  %597 = vst.msk [vmem:[#allocation2] sm:$0xff] %vm596_vm2, %v1752_v28  ;;  %599 = vst.msk [vmem:[#allocation2 + $0x10] sm:$0xff] %vm596_vm2, %v1752_v28  ;;  %1530 = vmatprep.subr.mxu1 %v657_v32  ;;  %v655_v38 = vld [vmem:[%s2206_s5 + $0x48] sm:$0xff]  ;;  %v654_v39 = vld [vmem:[%s2206_s5 + $0x40] sm:$0xff]  ;;  %vm610_vm3 = vcmask 1046528  }
  0x1a   : > { %s447_s19 = scalar_lea.vmem %s2223_s0, %s1877_s16  ;;  %s452_s28 = scalar_lea.vmem %s2224_s1, %s1877_s16  ;;  %1526 = vmatpush3.msk.msra.mxu0 %vm515_vm1, %v501_v17  ;;  %600 = vst.msk [vmem:[#allocation2 + $0x18] sm:$0xff] %vm596_vm2, %v1752_v28  ;;  %598 = vst.msk [vmem:[#allocation2 + $0x8] sm:$0xff] %vm596_vm2, %v1752_v28  ;;  %1531 = vmatpush3.msra.mxu1 %v657_v32  ;;  %v653_v40 = vld [vmem:[%s2206_s5 + $0x38] sm:$0xff]  ;;  %v652_v41 = vld [vmem:[%s2206_s5 + $0x30] sm:$0xff]  ;;  %vm624_vm4 = vcmask 1045504   ;;  %vm642_vm5 = vcmask 523264  }
  0x1b   : > { %v464_v0 = vld [vmem:[%s447_s19] sm:$0xff]  ;;  %v465_v1 = vld [vmem:[%s447_s19 + $0x8] sm:$0xff]  ;;  %1532 = vmatprep.subr.mxu1 %v656_v34  ;;  %v649_v48 = vld [vmem:[%s2206_s5 + $0x18] sm:$0xff]  ;;  %vm668_vm6 = vcmask 1040384   ;;  %vm674_vm7 = vcmask 785408   ;;  %s1423_s0 = sshll.u32 %s1874_s15, 1 }
  0x1c   : > { %v467_v2 = vsel %vm466_vm0, %v464_v0, -inf  ;;  %v470_v3 = vsel %vm466_vm0, %v465_v1, -inf  ;;  %v462_v5 = vld [vmem:[%s452_s28] sm:$0xff]  ;;  %v463_v16 = vld [vmem:[%s452_s28 + $0x8] sm:$0xff]  ;;  %1533 = vmatpush3.msra.mxu1 %v656_v34  ;;  %v648_v49 = vld [vmem:[%s2206_s5 + $0x10] sm:$0xff]  ;;  %vm956_vm8 = vcmask 1041408  }
  0x1d   : > { %468 = vmax.xlane.f32.xlu0 %v467_v2  ;;  %1534 = vmatprep.subr.mxu1 %v655_v38  ;;  %v651_v44 = vld [vmem:[%s2206_s5 + $0x28] sm:$0xff]  ;;  %v650_v46 = vld [vmem:[%s2206_s5 + $0x20] sm:$0xff]  ;;  %s440_s28 = sand.u32 1, %s1741_s22   ;;  %s1756_s1 = smov [#allocation3]  }
  0x1e   : > { %1535 = vmatpush3.msra.mxu1 %v655_v38  ;;  %v647_v51 = vld [vmem:[%s2206_s5 + $0x8] sm:$0xff]  ;;  %v646_v52 = vld [vmem:[%s2206_s5] sm:$0xff]  ;;  %s1418_s15 = sshll.u32 %s440_s28, 4 }
  0x1f   : > { %1536 = vmatprep.subr.mxu1 %v654_v39  ;;  %v777_v28 = vld [vmem:[%s2208_s7 + $0x8] sm:$0xff] }
  0x20   : > { %1537 = vmatpush3.msra.mxu1 %v654_v39  ;;  %v1970_v62 = vld [vmem:[#allocation2] sm:$0xff] }
  0x21   : > { %471 = vmax.xlane.f32.xlu0 %v470_v3  ;;  %1538 = vmatprep.subr.mxu1 %v653_v40  ;;  %v1962_v54 = vld [vmem:[#allocation2 + $0x18] sm:$0xff] }
  0x22   : > { %1539 = vmatpush3.msra.mxu1 %v653_v40  ;;  %v628_v57 = vrot.slane %v1962_v54, 2 }
  0x23   : > { %1540 = vmatprep.subr.mxu1 %v652_v41 }
  0x24   : > { %1541 = vmatpush3.msra.mxu1 %v652_v41  ;;  %v1449_v41 = vld [vmem:[%s2206_s5 + $0xb8] sm:$0xff] }
  0x25   : > { %1542 = vmatprep.subr.mxu1 %v651_v44 }
  0x26   : > { %1543 = vmatpush3.msra.mxu1 %v651_v44  ;;  %v1447_v44 = vld [vmem:[%s2206_s5 + $0xa8] sm:$0xff] }
  0x27   : > { %1544 = vmatprep.subr.mxu1 %v650_v46 }
  0x28   : > { %1545 = vmatpush3.msra.mxu1 %v650_v46  ;;  %v1446_v46 = vld [vmem:[%s2206_s5 + $0xa0] sm:$0xff] }
  0x29   : > { %1546 = vmatprep.subr.mxu1 %v649_v48 }
  0x2a   : > { %1547 = vmatpush3.msra.mxu1 %v649_v48 }
  0x2b   : > { %1548 = vmatprep.subr.mxu1 %v648_v49 }
  0x2c   : > { %1549 = vmatpush3.msra.mxu1 %v648_v49  ;;  %v1435_v49 = vld [vmem:[%s2209_s8] ss:$0 sm:$0xff] }
  0x2d   : > { %1550 = vmatprep.subr.mxu1 %v647_v51 }
  0x2e   : > { %1551 = vmatpush3.msra.mxu1 %v647_v51 }
  0x2f   : > { %1552 = vmatprep.subr.mxu1 %v646_v52 }
  0x30   : > { %1553 = vmatpush3.msra.mxu1 %v646_v52 }
  0x37   : > { %491 = vperm.xlu0 %1663, %v462_v5  }
  0xa6   : > { %v469_v6 = vpop.xlane.xlu0 %468 }
  0xa7   : > { %v473_v7 = vsub.f32 %v464_v0, %v469_v6 }
  0xa9   : > { %v475_v8 = vmul.f32 1.442695, %v473_v7 }
  0xaa   : > { %v472_v9 = vpop.xlane.xlu0 %471 }
  0xab   : > { %1665 = vpow2.f32 %v475_v8  ;;  %v474_v10 = vsub.f32 %v465_v1, %v472_v9 }
  0xad   : > { %v477_v11 = vmul.f32 1.442695, %v474_v10 }
  0xaf   : > { %1667 = vpow2.f32 %v477_v11 }
  0xb2   : > { %v1896_v21 = vpop.permute.xlu0 %491 }
  0xb8   : > { %v1666_v12 = vpop.eup %1665 }
  0xb9   : > { %v479_v13 = vsel %vm466_vm0, %v1666_v12, 0.0 }
  0xba   : > { %480 = vadd.xlane.f32.xlu1 %v479_v13  ;;  %v779_v13 = vld [vmem:[%s2208_s7 + $0x18] sm:$0xff] }
  0xbb   : > { %1557 = vmatprep.subr.mxu0 %v779_v13 }
  0xbc   : > { %v1668_v14 = vpop.eup %1667 }
  0xbd   : > { %v482_v15 = vsel %vm466_vm0, %v1668_v14, 0.0 }
  0xbe   : > { %483 = vadd.xlane.f32.xlu1 %v482_v15  ;;  %v1430_v15 = vld [vmem:[%s2207_s6] ss:$0 sm:$0xff] }
  0xcf   : > { %496 = vperm.xlu1 %1664, %v463_v16  }
 0x143   : > { %v481_v18 = vpop.xlane.xlu1 %480 }
 0x144   : > { %1669 = vrcp.f32 %v481_v18 }
 0x147   : > { %v484_v19 = vpop.xlane.xlu1 %483 }
 0x148   : > { %1671 = vrcp.f32 %v484_v19 }
 0x14b   : > { %v1899_v25 = vpop.permute.xlu1 %496 }
 0x151   : > { %v1670_v20 = vpop.eup %1669 }
 0x152   : > { %v487_v22 = vmul.f32 %v1670_v20, %v1666_v12 }
 0x154   : > { %v499_v23 = vmul.f32 %v1896_v21, %v487_v22 }
 0x155   : > { %v1672_v24 = vpop.eup %1671 }
 0x156   : > { %1527 = vmatprep.mubr.msk.f32.mxu0 %vm466_vm0, %v499_v23  ;;  %v488_v26 = vmul.f32 %v1672_v24, %v1668_v14  ;;  %v778_v14 = vld [vmem:[%s2208_s7 + $0x10] sm:$0xff] }
 0x158   : > { %v500_v27 = vmul.f32 %v1899_v25, %v488_v26 }
 0x15a   : > { %1528 = vmatmul.mubr.msk.f32.vlgmr.msra.gmra.mxu0 %vm466_vm0, %v500_v27 }
 0x15b   : > { %1558 = vmatpush3.msra.mxu0 %v779_v13 }
 0x15c   : > { %1559 = vmatprep.subr.mxu0 %v778_v14 }
 0x15d   : > { %1560 = vmatpush3.msra.mxu0 %v778_v14 }
 0x15e   : > { %1561 = vmatprep.subr.mxu0 %v777_v28 }
 0x15f   : > { %1562 = vmatpush3.msra.mxu0 %v777_v28 }
 0x21a   : > { %v1529_v30 = vpop.f32.mrf.mxu0 }
 0x21b   : > { %v591_v31 = vadd.f32 %v1529_v30, %v1426_v29  ;;  %v871_v30 = vlaneseq }
 0x21c   : > { %v585_v33 = vpop.f32.mrf.mxu0 }
 0x21d   : > { %v595_v35 = vmul.f32 %v591_v31, %v1899_v25  ;;  %v586_v36 = vadd.f32 %v1426_v29, %v585_v33  ;;  %v776_v29 = vld [vmem:[%s2208_s7] sm:$0xff]  ;;  %v1999_v31 = vshrl.u32 %v871_v30, 7 }
 0x21e   : > { %1563 = vmatprep.subr.mxu0 %v776_v29 }
 0x21f   : > { %602 = vst.msk [vmem:[#allocation2 + $0x10] sm:$0xff] %vm596_vm2, %v595_v35  ;;  %v594_v37 = vmul.f32 %v586_v36, %v1896_v21  ;;  %1564 = vmatpush3.msra.mxu0 %v776_v29  ;;  %v873_v32 = vsub.s32 0, %v1999_v31 }
 0x220   : > { %1568 = vmatprep.subr.mxu0 %v1449_v41 }
 0x221   : > { %601 = vst.msk [vmem:[#allocation2 + $0x8] sm:$0xff] %vm596_vm2, %v594_v37 }
 0x226   : > { %v1933_v42 = vld [vmem:[#allocation2 + $0x10] sm:$0xff] }
 0x227   : > { %v612_v43 = vrot.slane %v1933_v42, 1  ;;  %v626_v55 = vrot.slane %v1933_v42, 2 }
 0x228   : > { %v1939_v45 = vld [vmem:[#allocation2 + $0x8] sm:$0xff] }
 0x229   : > { %618 = vrot.lane.b32.xlu1 %v612_v43, %s2216_s26  ;;  %v611_v47 = vrot.slane %v1939_v45, 1  ;;  %v625_v50 = vrot.slane %v1939_v45, 2  ;;  %v629_v58 = vsel %vm624_vm4, %v626_v55, %v628_v57 }
 0x22b   : > { %v613_v53 = vsel %vm610_vm3, %v611_v47, %v612_v43  ;;  %v627_v56 = vsel %vm624_vm4, %v625_v50, %v626_v55  ;;  %v1448_v43 = vld [vmem:[%s2206_s5 + $0xb0] sm:$0xff] }
 0x22d   : > { %614 = vrot.lane.b32.xlu1 %v611_v47, %s2216_s26  ;;  %v1445_v47 = vld [vmem:[%s2206_s5 + $0x98] sm:$0xff] }
 0x231   : > { %630 = vrot.lane.b32.xlu1 %v625_v50, %s2214_s20 }
 0x235   : > { %616 = vrot.lane.b32.xlu1 %v613_v53, %s2216_s26  ;;  %s456_s26 = scalar_lea.vmem %s2225_s2, %s1423_s0  ;;  %s2150_s0 = scalar_lea.sflag [#allocation4], %s440_s28 }
 0x236   : > { %v2005_v34 = vld [vmem:[%s456_s26] sm:$0x3]  ;;  %s442_s26 = scalar_lea.vmem [#allocation3], %s1418_s15 }
 0x237   : > { %v880_v36 = vrot.slane %v2005_v34, %v873_v32  ;;  %v2029_v48 = vadd.f32 1.0, %v2005_v34 }
 0x239   : > { %632 = vrot.lane.b32.xlu1 %v627_v56, %s2214_s20  ;;  %v874_v52 = vrot.slane %v2029_v48, %v873_v32 }
 0x23d   : > { %634 = vrot.lane.b32.xlu1 %v629_v58, %s2214_s20  ;;  %s2226_s20 = smov 32  }
 0x29b   : > { %v619_v59 = vpop.permute.xlu1 %618 }
 0x29c   : > { %v641_v7 = vsel %vm596_vm2, %v1933_v42, %v619_v59 }
 0x29f   : > { %v615_v60 = vpop.permute.xlu1 %614 }
 0x2a0   : > { %v639_v0 = vsel %vm596_vm2, %v1970_v62, %v615_v60 }
 0x2a3   : > { %v631_v61 = vpop.permute.xlu1 %630 }
 0x2a4   : > { %v643_v1 = vsel %vm642_vm5, %v639_v0, %v631_v61 }
 0x2a5   : > { %v669_v5 = vrot.slane %v643_v1, 7  ;;  %v1444_v1 = vld [vmem:[%s2206_s5 + $0x90] sm:$0xff] }
 0x2a7   : > { %v617_v63 = vpop.permute.xlu1 %616 }
 0x2a8   : > { %v640_v2 = vsel %vm596_vm2, %v1939_v45, %v617_v63 }
 0x2ab   : > { %v633_v3 = vpop.permute.xlu1 %632 }
 0x2ac   : > { %v644_v4 = vsel %vm642_vm5, %v640_v2, %v633_v3 }
 0x2ad   : > { %v670_v6 = vrot.slane %v644_v4, 7  ;;  %v1443_v4 = vld [vmem:[%s2206_s5 + $0x88] sm:$0xff] }
 0x2af   : > { %v635_v8 = vpop.permute.xlu1 %634  ;;  %v671_v9 = vsel %vm668_vm6, %v669_v5, %v670_v6 }
 0x2b0   : > { %v645_v10 = vsel %vm642_vm5, %v641_v7, %v635_v8  ;;  %1554 = vmatprep.mubr.msk.f32.mxu1 %vm674_vm7, %v671_v9  ;;  %v1439_v7 = vld [vmem:[%s2206_s5 + $0x68] sm:$0xff] }
 0x2b1   : > { %v672_v11 = vrot.slane %v645_v10, 7  ;;  %v1438_v10 = vld [vmem:[%s2206_s5 + $0x60] sm:$0xff] }
 0x2b3   : > { %v673_v12 = vsel %vm668_vm6, %v670_v6, %v672_v11  ;;  %v1440_v6 = vld [vmem:[%s2206_s5 + $0x70] sm:$0xff] }
 0x2b4   : > { %1555 = vmatmul.mubr.msk.f32.vlgmr.msra.gmra.mxu1 %vm674_vm7, %v673_v12 }
 0x374   : > { %v1556_v16 = vpop.f32.mrf.mxu1 }
 0x375   : > { %v751_v17 = vadd.f32 %v1556_v16, %v1430_v15  ;;  %v915_v16 = vrot.slane %v1962_v54, 4 }
 0x376   : > { %v745_v18 = vpop.f32.mrf.mxu1 }
 0x377   : > { %v1434_v19 = vmul.f32 -1.442695, %v751_v17  ;;  %v746_v20 = vadd.f32 %v1430_v15, %v745_v18 }
 0x379   : > { %1673 = vpow2.f32 %v1434_v19  ;;  %v1433_v22 = vmul.f32 -1.442695, %v746_v20 }
 0x37b   : > { %1675 = vpow2.f32 %v1433_v22 }
 0x386   : > { %v1674_v23 = vpop.eup %1673 }
 0x387   : > { %v761_v24 = vadd.f32 1.0, %v1674_v23 }
 0x388   : > { %v1676_v26 = vpop.eup %1675 }
 0x389   : > { %1677 = vrcp.f32 %v761_v24  ;;  %v760_v27 = vadd.f32 1.0, %v1676_v26 }
 0x38b   : > { %1679 = vrcp.f32 %v760_v27 }
 0x396   : > { %v1678_v33 = vpop.eup %1677 }
 0x397   : > { %770 = vrot.lane.b32.xlu0 %v1678_v33, %s1755_s29 }
 0x398   : > { %v1680_v35 = vpop.eup %1679 }
 0x399   : > { %768 = vrot.lane.b32.xlu1 %v1680_v35, %s1755_s29 }
 0x39d   : > { %882 = vrot.lane.b32.xlu1 %v880_v36, %s1755_s29 }
 0x409   : > { %v771_v37 = vpop.permute.xlu0 %770 }
 0x40a   : > { %v775_v40 = vmul.f32 %v771_v37, %v751_v17 }
 0x40b   : > { %v769_v38 = vpop.permute.xlu1 %768 }
 0x40c   : > { %v774_v39 = vmul.f32 %v769_v38, %v746_v20  ;;  %v1459_v38 = vld [vmem:[%s2208_s7 + $0x38] sm:$0xff] }
 0x40d   : > { %1595 = vmatprep.subr.mxu1 %v1459_v38 }
 0x40e   : > { %1565 = vmatprep.mubr.msk.f32.mxu0 %vm596_vm2, %v774_v39  ;;  %v1458_v39 = vld [vmem:[%s2208_s7 + $0x30] sm:$0xff]  ;;  %1596 = vmatpush3.msra.mxu1 %v1459_v38 }
 0x40f   : > { %1566 = vmatmul.mubr.msk.f32.vlgmr.msra.gmra.mxu0 %vm596_vm2, %v775_v40  ;;  %v883_v57 = vpop.permute.xlu1 %882  ;;  %1597 = vmatprep.subr.mxu1 %v1458_v39  ;;  %v1451_v40 = vld [vmem:[%s2207_s6 + $0x1] ss:$0 sm:$0xff] }
 0x410   : > { %1569 = vmatpush3.msra.mxu0 %v1449_v41  ;;  %1598 = vmatpush3.msra.mxu1 %v1458_v39 }
 0x411   : > { %1570 = vmatprep.subr.mxu0 %v1448_v43 }
 0x412   : > { %1571 = vmatpush3.msra.mxu0 %v1448_v43 }
 0x413   : > { %1572 = vmatprep.subr.mxu0 %v1447_v44 }
 0x414   : > { %1573 = vmatpush3.msra.mxu0 %v1447_v44 }
 0x415   : > { %1574 = vmatprep.subr.mxu0 %v1446_v46 }
 0x416   : > { %1575 = vmatpush3.msra.mxu0 %v1446_v46 }
 0x417   : > { %1576 = vmatprep.subr.mxu0 %v1445_v47 }
 0x418   : > { %1577 = vmatpush3.msra.mxu0 %v1445_v47 }
 0x419   : > { %1578 = vmatprep.subr.mxu0 %v1444_v1 }
 0x41a   : > { %1579 = vmatpush3.msra.mxu0 %v1444_v1 }
 0x41b   : > { %1580 = vmatprep.subr.mxu0 %v1443_v4 }
 0x41c   : > { %1581 = vmatpush3.msra.mxu0 %v1443_v4  ;;  %v1461_v4 = vld [vmem:[%s2209_s8 + $0x1] ss:$0 sm:$0xff] }
 0x4cf   : > { %v1567_v50 = vpop.f32.mrf.mxu0 }
 0x4d0   : > { %v865_v51 = vadd.f32 %v1567_v50, %v1435_v49 }
 0x4d1   : > { %v859_v53 = vpop.f32.mrf.mxu0 }
 0x4d2   : > { %v869_v55 = vmax.f32 %v865_v51, 0.0  ;;  %v860_v56 = vadd.f32 %v1435_v49, %v859_v53 }
 0x4d4   : > { %v876_v58 = vmul.f32 %v874_v52, %v869_v55  ;;  %v868_v59 = vmax.f32 %v860_v56, 0.0  ;;  %v1457_v55 = vld [vmem:[%s2208_s7 + $0x28] sm:$0xff]  ;;  %v1456_v56 = vld [vmem:[%s2208_s7 + $0x20] sm:$0xff] }
 0x4d5   : > { %1599 = vmatprep.subr.mxu1 %v1457_v55 }
 0x4d6   : > { %v875_v60 = vmul.f32 %v874_v52, %v868_v59  ;;  %v886_v61 = vadd.f32 %v883_v57, %v876_v58  ;;  %1600 = vmatpush3.msra.mxu1 %v1457_v55 }
 0x4d7   : > { %1601 = vmatprep.subr.mxu1 %v1456_v56 }
 0x4d8   : > { %v885_v63 = vadd.f32 %v883_v57, %v875_v60  ;;  %v888_v0 = vadd.f32 %v886_v61, %v1933_v42  ;;  %v1442_v42 = vld [vmem:[%s2206_s5 + $0x80] sm:$0xff]  ;;  %1602 = vmatpush3.msra.mxu1 %v1456_v56  ;;  %v1161_v57 = vsub.s32 1, %v1999_v31  ;;  %v1188_v31 = vld [vmem:[%s2210_s9 + $0x18] sm:$0xff] }
 0x4d9   : > { %1582 = vmatprep.subr.mxu0 %v1442_v42  ;;  %1606 = vmatprep.subr.mxu1 %v1188_v31 }
 0x4da   : > { %v887_v2 = vadd.f32 %v885_v63, %v1939_v45  ;;  %v890_v3 = vmul.f32 %v888_v0, %v1899_v25  ;;  %1583 = vmatpush3.msra.mxu0 %v1442_v42  ;;  %v1441_v45 = vld [vmem:[%s2206_s5 + $0x78] sm:$0xff]  ;;  %v1168_v60 = vrot.slane %v2005_v34, %v1161_v57  ;;  %v1187_v34 = vld [vmem:[%s2210_s9 + $0x10] sm:$0xff] }
 0x4db   : > { %1584 = vmatprep.subr.mxu0 %v1441_v45 }
 0x4dc   : > { %v889_v5 = vmul.f32 %v887_v2, %v1896_v21  ;;  %892 = vst.msk [vmem:[#allocation2 + $0x10] sm:$0xff] %vm596_vm2, %v890_v3  ;;  %1585 = vmatpush3.msra.mxu0 %v1441_v45  ;;  %v1186_v2 = vld [vmem:[%s2210_s9 + $0x8] sm:$0xff]  ;;  %v1185_v3 = vld [vmem:[%s2210_s9] sm:$0xff]  ;;  %v1162_v45 = vrot.slane %v2029_v48, %v1161_v57 }
 0x4dd   : > { %1586 = vmatprep.subr.mxu0 %v1440_v6 }
 0x4de   : > { %891 = vst.msk [vmem:[#allocation2 + $0x8] sm:$0xff] %vm596_vm2, %v889_v5  ;;  %1587 = vmatpush3.msra.mxu0 %v1440_v6 }
 0x4df   : > { %1588 = vmatprep.subr.mxu0 %v1439_v7 }
 0x4e0   : > { %1589 = vmatpush3.msra.mxu0 %v1439_v7 }
 0x4e1   : > { %1590 = vmatprep.subr.mxu0 %v1438_v10 }
 0x4e2   : > { %1591 = vmatpush3.msra.mxu0 %v1438_v10 }
 0x4e3   : > { %v2059_v8 = vld [vmem:[#allocation2 + $0x10] sm:$0xff] }
 0x4e4   : > { %v900_v9 = vrot.slane %v2059_v8, 2  ;;  %v913_v15 = vrot.slane %v2059_v8, 4 }
 0x4e5   : > { %v2065_v11 = vld [vmem:[#allocation2 + $0x8] sm:$0xff] }
 0x4e6   : > { %906 = vrot.lane.b32.xlu0 %v900_v9, %s2226_s20  ;;  %v912_v12 = vrot.slane %v2065_v11, 4  ;;  %v899_v13 = vrot.slane %v2065_v11, 2  ;;  %v916_v18 = vsel %vm515_vm1, %v913_v15, %v915_v16 }
 0x4e8   : > { %917 = vrot.lane.b32.xlu1 %v912_v12, %s2227_s17  ;;  %v901_v14 = vsel %vm624_vm4, %v899_v13, %v900_v9  ;;  %v914_v17 = vsel %vm515_vm1, %v912_v12, %v913_v15 }
 0x4ea   : > { %902 = vrot.lane.b32.xlu0 %v899_v13, %s2226_s20 }
 0x4ec   : > { %904 = vrot.lane.b32.xlu1 %v901_v14, %s2226_s20  ;;  %s1303_s20 = sshll.u32 %s442_s26, 4  ;;  %s2148_s20 = int_to_ptr.vmem [resolvable:$true] %s1303_s20 }
 0x4ed   : > { %s1689_s15 = scalar_lea.vmem %s2148_s20, 256 }
 0x4ee   : > { %919 = vrot.lane.b32.xlu0 %v914_v17, %s2227_s17  ;;  %p1690_p11 = scmp.ne.s32.totalorder %s2148_s20, %s1689_s15 }
 0x4f0   : > { %921 = vrot.lane.b32.xlu1 %v916_v18, %s2227_s17  ;;  %p1691_p12 = pnand %p1690_p11, %p1862_p5 }
 0x4f2   : > { %p1692_p13 = pneg %p1691_p12 }
 0x558   : > { %v907_v19 = vpop.permute.xlu0 %906 }
 0x559   : > { %v928_v29 = vsel %vm596_vm2, %v2059_v8, %v907_v19 }
 0x55a   : > { %v918_v20 = vpop.permute.xlu1 %917 }
 0x55c   : > { %v903_v22 = vpop.permute.xlu0 %902 }
 0x55d   : > { %v926_v23 = vsel %vm596_vm2, %v1970_v62, %v903_v22 }
 0x55e   : > { %v905_v24 = vpop.permute.xlu1 %904  ;;  %v929_v26 = vsel %vm642_vm5, %v926_v23, %v918_v20 }
 0x55f   : > { %v927_v54 = vsel %vm596_vm2, %v2065_v11, %v905_v24  ;;  %v957_v30 = vrot.slane %v929_v26, 6 }
 0x560   : > { %v920_v27 = vpop.permute.xlu0 %919 }
 0x561   : > { %v930_v28 = vsel %vm642_vm5, %v927_v54, %v920_v27 }
 0x562   : > { %v958_v32 = vrot.slane %v930_v28, 6  ;;  %v922_v33 = vpop.permute.xlu1 %921 }
 0x563   : > { %v931_v35 = vsel %vm642_vm5, %v928_v29, %v922_v33 }
 0x564   : > { %v960_v36 = vrot.slane %v931_v35, 6  ;;  %v959_v62 = vsel %vm956_vm8, %v957_v30, %v958_v32 }
 0x565   : > { %1592 = vmatprep.mubr.msk.f32.mxu0 %vm674_vm7, %v959_v62 }
 0x566   : > { %v961_v37 = vsel %vm956_vm8, %v958_v32, %v960_v36 }
 0x567   : > { %1593 = vmatmul.mubr.msk.f32.vlgmr.msra.gmra.mxu0 %vm674_vm7, %v961_v37 }
 0x627   : > { %v1594_v41 = vpop.f32.mrf.mxu0 }
 0x628   : > { %v1038_v43 = vadd.f32 %v1594_v41, %v1451_v40 }
 0x629   : > { %v1032_v44 = vpop.f32.mrf.mxu0 }
 0x62a   : > { %v1455_v46 = vmul.f32 -1.442695, %v1038_v43  ;;  %v1033_v47 = vadd.f32 %v1451_v40, %v1032_v44 }
 0x62c   : > { %1681 = vpow2.f32 %v1455_v46  ;;  %v1454_v49 = vmul.f32 -1.442695, %v1033_v47 }
 0x62e   : > { %1683 = vpow2.f32 %v1454_v49 }
 0x639   : > { %v1682_v50 = vpop.eup %1681 }
 0x63a   : > { %v1048_v51 = vadd.f32 1.0, %v1682_v50 }
 0x63b   : > { %v1684_v52 = vpop.eup %1683 }
 0x63c   : > { %1685 = vrcp.f32 %v1048_v51  ;;  %v1047_v53 = vadd.f32 1.0, %v1684_v52 }
 0x63e   : > { %1687 = vrcp.f32 %v1047_v53 }
 0x649   : > { %v1686_v58 = vpop.eup %1685 }
 0x64a   : > { %1057 = vrot.lane.b32.xlu1 %v1686_v58, %s1755_s29 }
 0x64b   : > { %v1688_v59 = vpop.eup %1687 }
 0x64c   : > { %1055 = vrot.lane.b32.xlu0 %v1688_v59, %s1755_s29 }
 0x650   : > { %1170 = vrot.lane.b32.xlu0 %v1168_v60, %s1755_s29  ;;  %s1475_s29 = sshll.u32 %s1845_s25, 8  ;;  %s1693_s25 = sshll.u32 %s1756_s1, 4  ;;  %s1694_s25 = int_to_ptr.vmem [resolvable:$false] %s1693_s25 }
 0x651   : > { %s2146_s19 = scalar_lea.hbm %s2213_s12, %s1475_s29  ;;  %p1696_p0 = scmp.lt.s32.totalorder %s2148_s20, %s1694_s25 }
 0x6bc   : > { %v1058_v61 = vpop.permute.xlu1 %1057 }
 0x6bd   : > { %v1062_v1 = vmul.f32 %v1058_v61, %v1038_v43 }
 0x6be   : > { %v1056_v63 = vpop.permute.xlu0 %1055 }
 0x6bf   : > { %v1061_v0 = vmul.f32 %v1056_v63, %v1033_v47 }
 0x6c1   : > { %1603 = vmatprep.mubr.msk.f32.mxu1 %vm596_vm2, %v1061_v0 }
 0x6c2   : > { %1604 = vmatmul.mubr.msk.f32.vlgmr.msra.gmra.mxu1 %vm596_vm2, %v1062_v1  ;;  %v1171_v10 = vpop.permute.xlu0 %1170 }
 0x6c3   : > { %1607 = vmatpush3.msra.mxu1 %v1188_v31 }
 0x6c4   : > { %1608 = vmatprep.subr.mxu1 %v1187_v34 }
 0x6c5   : > { %1609 = vmatpush3.msra.mxu1 %v1187_v34 }
 0x6c6   : > { %1610 = vmatprep.subr.mxu1 %v1186_v2 }
 0x6c7   : > { %1611 = vmatpush3.msra.mxu1 %v1186_v2 }
 0x6c8   : > { %1612 = vmatprep.subr.mxu1 %v1185_v3 }
 0x6c9   : > { %1613 = vmatpush3.msra.mxu1 %v1185_v3 }
 0x782   : > { %v1605_v5 = vpop.f32.mrf.mxu1 }
 0x783   : > { %v1154_v42 = vadd.f32 %v1605_v5, %v1461_v4 }
 0x784   : > { %v1148_v6 = vpop.f32.mrf.mxu1 }
 0x785   : > { %v1158_v7 = vmax.f32 %v1154_v42, 0.0  ;;  %v1149_v9 = vadd.f32 %v1461_v4, %v1148_v6 }
 0x787   : > { %v1157_v12 = vmax.f32 %v1149_v9, 0.0  ;;  %v1164_v13 = vmul.f32 %v1162_v45, %v1158_v7 }
 0x789   : > { %v1163_v14 = vmul.f32 %v1162_v45, %v1157_v12  ;;  %v1174_v15 = vadd.f32 %v1171_v10, %v1164_v13 }
 0x78b   : > { %v1173_v16 = vadd.f32 %v1171_v10, %v1163_v14  ;;  %v1176_v17 = vadd.f32 %v1174_v15, %v2059_v8 }
 0x78d   : > { %v1175_v18 = vadd.f32 %v1173_v16, %v2065_v11  ;;  %v1178_v19 = vmul.f32 %v1176_v17, %v1899_v25 }
 0x78f   : > { %v1177_v48 = vmul.f32 %v1175_v18, %v1896_v21  ;;  %1180 = vst.msk [vmem:[#allocation2 + $0x10] sm:$0xff] %vm596_vm2, %v1178_v19  ;;  %v1182_v20 = vmul.f32 %v1178_v19, %v1899_v25 }
 0x791   : > { %1179 = vst.msk [vmem:[#allocation2 + $0x8] sm:$0xff] %vm596_vm2, %v1177_v48  ;;  %v1181_v22 = vmul.f32 %v1177_v48, %v1896_v21  ;;  %1614 = vmatprep.mubr.msk.f32.mxu1 %vm596_vm2, %v1177_v48  ;;  %1184 = vst.msk [vmem:[%s442_s26 + $0x8] sm:$0xff] %vm596_vm2, %v1182_v20 }
 0x792   : > { %1615 = vmatmul.mubr.msk.f32.vlgmr.msra.gmra.mxu1 %vm596_vm2, %v1178_v19 }
 0x793   : > { %1183 = vst.msk [vmem:[%s442_s26] sm:$0xff] %vm596_vm2, %v1181_v22  ;;  %s1695_s26 = scalar_lea.vmem %s1694_s25, 512 }
 0x794   : > { %p1697_p1 = scmp.lt.s32.totalorder %s1695_s26, %s1689_s15 }
 0x796   : > { %p1698_p2 = por %p1697_p1, %p1696_p0 }
 0x798   : > { %p1699_p3 = pnand %p1698_p2, %p1692_p13 }
 0x79a   : > { %1702 = shalt.err (!%p1699_p3)
}
 0x79b   : > { %s1703_s28 = scalar_lea.hbm %s2146_s19, 256  ;;  %s1707_s1 = scalar_lea.hbm %s2213_s12, 512 }
 0x79c   : > { %p1704_p4 = scmp.ne.s32.totalorder %s2146_s19, %s1703_s28  ;;  %p1708_p9 = scmp.lt.s32.totalorder %s2146_s19, %s2213_s12 }
 0x79d   : > { %p1709_p10 = scmp.lt.s32.totalorder %s1707_s1, %s1703_s28 }
 0x79e   : > { %p1705_p7 = pnand %p1704_p4, %p1862_p5 }
 0x79f   : > { %p1710_p11 = por %p1709_p10, %p1708_p9 }
 0x7a0   : > { %p1706_p8 = pneg %p1705_p7 }
 0x7a2   : > { %p1711_p12 = pnand %p1710_p11, %p1706_p8 }
 0x7a4   : > { %1714 = shalt.err (!%p1711_p12)
}
 0x7a5   : > { %s1757_s15 = smov 128   ;;  %s1758_s25 = smov 8   ;;  %v1464_v8 = vld [vmem:[%s2211_s10] ss:$0 sm:$0xff] }
 0x7a6   : > { %1617 = dma.vmem_to_hbm [thread:$0]  (%p1862_p5), %s2148_s20, 256, %s2146_s19, %s2150_s0, %s1757_s15, %s1757_s15, %s1758_s25  }
 0x7a7   : > { %s461_s17 = scalar_lea.vmem %s2212_s11, %s1877_s16 }
 0x852   : > { %v1616_v11 = vpop.f32.mrf.mxu1 }
 0x853   : > { %v1274_v23 = vadd.f32 %v1616_v11, %v1464_v8 }
 0x854   : > { %v1268_v24 = vpop.f32.mrf.mxu1 }
 0x855   : > { %v1278_v26 = vmul.f32 %v1274_v23, %v1899_v25  ;;  %v1269_v54 = vadd.f32 %v1464_v8, %v1268_v24 }
 0x857   : > { %1280 = vst.msk [vmem:[%s461_s17 + $0x8] sm:$0xff] %vm466_vm0, %v1278_v26  ;;  %v1277_v27 = vmul.f32 %v1269_v54, %v1896_v21 }
 0x859   : > { %1279 = vst.msk [vmem:[%s461_s17] sm:$0xff] %vm466_vm0, %v1277_v27 }
 0x85a PF: > { %p1623_p5 = scmp.ge.s32.totalorder %s1749_s24, 2  ;;  %s1326_s13 = sand.u32 1, %s1737_s21  }
 0x85b   : > { %s1327_s16 = scalar_lea.sflag [#allocation4], %s1326_s13 }
 0x85c   : > { %p1620_p13 = pnand %p1623_p5, %p1866_p6 }
 0x85e   : > { %p1621_p0 = pneg %p1620_p13 }
 0x860   : > { %1732 = dma.done.wait (%p1621_p0), %s1327_s16, 256  }
 0x861   : > { %1734 = vsyncadd (%p1621_p0), %s1327_s16, 4294967040  ;;  %p23_p1 = scmp.ge.s32.totalorder %s1849_s27, 4   ;;  %s2228_s21 = smov %s1741_s22 }
 0x862   : > { %s2229_s22 = smov %s1745_s23  ;;  %s2230_s23 = smov %s1860_s30 }
 0x863   : > { %s2231_s24 = smov %s1849_s27  ;;  %25 = sbr.rel (!%p23_p1) target bundleno = 7 (0x7), region = 121 }
 0x868   :  { %1332 = vsyncpa [#allocation4], 1 }
 0x869   :  { %1334 = vsyncpa [#allocation4 + $0x1], 1 }

// kernel: diff_multi_stage_forward.2
= control target key start
LH: loop header
LB: loop body
LE: loop exit
PB: predicated region body
PF: predicated region fallthrough
CT: control target
= control target key end

     0   :  { %s2162_s0 = inlined_call_operand.vmem [shape: f32[2,16,4], index: 0, kind: input, shape index: {}]   ;;  %s2163_s1 = inlined_call_operand.vmem [shape: f32[2,16,1], index: 1, kind: input, shape index: {}]   ;;  %s2164_s2 = inlined_call_operand.vmem [shape: f32[2,2,64], index: 2, kind: input, shape index: {}]   ;;  %s2165_s3 = inlined_call_operand.vmem [shape: f32[4,32], index: 3, kind: input, shape index: {}]   ;;  %s2166_s4 = inlined_call_operand.vmem [shape: f32[1,32], index: 4, kind: input, shape index: {}]   ;;  %s2167_s5 = inlined_call_operand.vmem [shape: f32[2,96,64], index: 5, kind: input, shape index: {}]   ;;  %s2168_s6 = inlined_call_operand.vmem [shape: f32[2,1,64], index: 6, kind: input, shape index: {}]   ;;  %s2169_s7 = inlined_call_operand.vmem [shape: f32[2,32,32], index: 7, kind: input, shape index: {}]   ;;  %s2170_s8 = inlined_call_operand.vmem [shape: f32[2,1,32], index: 8, kind: input, shape index: {}]   ;;  %s2171_s9 = inlined_call_operand.vmem [shape: f32[32,4], index: 9, kind: input, shape index: {}]   ;;  %s2172_s10 = inlined_call_operand.vmem [shape: f32[1,4], index: 10, kind: input, shape index: {}]   ;;  %s2173_s11 = inlined_call_operand.vmem [shape: f32[2,16,4], index: 11, kind: output, shape index: {0}]   ;;  %s2174_s12 = inlined_call_operand.hbm [shape: f32[2,16,32], index: 12, kind: output, shape index: {1}]  }
   0x1   :  { %2179 = sst [smem:[#allocation6_spill]] %s2162_s0 }
   0x2   :  { %2180 = sst [smem:[#allocation7_spill]] %s2163_s1 }
   0x3   :  { %2181 = sst [smem:[#allocation8_spill]] %s2164_s2 }
   0x4   :  { %18 = vsyncpa [#allocation4], 0 }
   0x5   :  { %20 = vsyncpa [#allocation4 + $0x1], 0  ;;  %s1791_s21 = smov 0   ;;  %s1793_s22 = smov 0  }
   0x6   :  { %s1795_s23 = smov 0   ;;  %s1797_s24 = smov 0  }
   0x7 LB: > { %s1812_s25 = sadd.s32 4294967295, %s1716_s24   ;;  %s1390_s26 = sadd.s32 4294967294, %s1716_s24   ;;  %s1716_s24 = sphi %s1797_s24, %s2192_s24   ;;  %s1712_s23 = sphi %s1795_s23, %s2191_s23   ;;  %s1708_s22 = sphi %s1793_s22, %s2190_s22   ;;  %s1704_s21 = sphi %s1791_s21, %s2189_s21  }
   0x8   : > { %s1816_s27 = sadd.s32 1, %s1716_s24   ;;  %s305_s28 = sadd.s32 1, %s1712_s23 }
   0x9   : > { %s302_s29 = ssub.s32 %s1716_s24, %s1816_s27  ;;  %p315_p0 = scmp.ne.s32.totalorder %s1712_s23, %s1708_s22 }
   0xa   : > { %p303_p1 = scmp.eq.s32.totalorder %s302_s29, 0  ;;  %p316_p2 = scmp.eq.s32.totalorder %s1812_s25, 1 }
   0xb   : > { %p321_p3 = scmp.ne.s32.totalorder %s1708_s22, %s1704_s21  ;;  %p322_p4 = scmp.eq.s32.totalorder %s1390_s26, 1 }
   0xc   : > { %s1827_s30 = scalar_select %p303_p1, %s1712_s23, %s305_s28  }
   0xd   : > { %p1829_p5 = por %p316_p2, %p315_p0  ;;  %p1833_p6 = por %p322_p4, %p321_p3 }
   0xe   : > { %p1393_p7 = scmp.ge.s32.totalorder %s1716_s24, 1  ;;  %p387_p8 = scmp.lt.s32.totalorder %s1716_s24, 3 }
  0x10   : > { %p388_p9 = pnand %p1393_p7, %p387_p8 }
  0x11   : > { %p443_p10 = scmp.lt.s32.totalorder (!%p388_p9), %s1812_s25, 1  ;;  %s2184_s0 = sld [smem:[#allocation6_spill]] (!%p388_p9) }
  0x12   : > { %391 = sbr.rel (%p388_p9) target bundleno = 1815 (0x717), region = 64  ;;  %s2185_s1 = sld [smem:[#allocation7_spill]] (!%p388_p9) }
  0x13   : > { %s2177_s29 = smov (!%p388_p9), 32   ;;  %s2186_s2 = sld [smem:[#allocation8_spill]] (!%p388_p9) }
  0x14   : > { %s2188_s28 = smov (!%p388_p9), 64   ;;  %s440_s20 = sand.u32 (!%p388_p9), 1, %s1708_s22  }
  0x17   : > { %v466_v0 = vld [vmem:[%s2165_s3] sm:$0xf]  ;;  %vm481_vm0 = vcmask 1043456   ;;  %v1718_v1 = vmov 0   ;;  %s1846_s17 = scalar_select %p443_p10, %s1812_s25, 1  ;;  %vm474_vm1 = vcmask 31744  }
  0x18   : > { %1501 = vmatprep.subr.msk.mxu0 %vm481_vm0, %v466_v0  ;;  %1639 = vset.pattern.permute.xlu0 %v1718_v1  ;;  %vm572_vm2 = vcmask 261120   ;;  %v1719_v6 = vmov 0.0   ;;  %v633_v7 = vld [vmem:[%s2167_s5 + $0x58] sm:$0xff]  ;;  %v632_v8 = vld [vmem:[%s2167_s5 + $0x50] sm:$0xff]  ;;  %v631_v9 = vld [vmem:[%s2167_s5 + $0x48] sm:$0xff]  ;;  %vm600_vm3 = vcmask 1045504  }
  0x19   : > { %1502 = vmatpush3.msk.msra.mxu0 %vm481_vm0, %v466_v0  ;;  %s1849_s18 = sshll.u32 %s1846_s17, 4  ;;  %573 = vst.msk [vmem:[#allocation2] sm:$0xff] %vm572_vm2, %v1719_v6  ;;  %575 = vst.msk [vmem:[#allocation2 + $0x10] sm:$0xff] %vm572_vm2, %v1719_v6  ;;  %1506 = vmatprep.subr.mxu1 %v633_v7  ;;  %v1402_v11 = vld [vmem:[%s2166_s4] ss:$0 sm:$0xff]  ;;  %v629_v19 = vld [vmem:[%s2167_s5 + $0x38] sm:$0xff] }
  0x1a   : > { %s447_s26 = scalar_lea.vmem %s2184_s0, %s1849_s18  ;;  %s452_s15 = scalar_lea.vmem %s2185_s1, %s1849_s18  ;;  %576 = vst.msk [vmem:[#allocation2 + $0x18] sm:$0xff] %vm572_vm2, %v1719_v6  ;;  %574 = vst.msk [vmem:[#allocation2 + $0x8] sm:$0xff] %vm572_vm2, %v1719_v6  ;;  %1507 = vmatpush3.msra.mxu1 %v633_v7  ;;  %v630_v15 = vld [vmem:[%s2167_s5 + $0x40] sm:$0xff]  ;;  %v628_v21 = vld [vmem:[%s2167_s5 + $0x30] sm:$0xff]  ;;  %vm586_vm4 = vcmask 1046528   ;;  %vm618_vm5 = vcmask 523264  }
  0x1b   : > { %v464_v2 = vld [vmem:[%s447_s26] sm:$0xff]  ;;  %v465_v3 = vld [vmem:[%s447_s26 + $0x8] sm:$0xff]  ;;  %1508 = vmatprep.subr.mxu1 %v632_v8  ;;  %v625_v24 = vld [vmem:[%s2167_s5 + $0x18] sm:$0xff]  ;;  %s2175_s26 = smov 64   ;;  %vm644_vm6 = vcmask 1040384   ;;  %vm650_vm7 = vcmask 785408  }
  0x1c   : > { %1503 = vmatprep.mubr.msk.f32.mxu0 %vm474_vm1, %v464_v2  ;;  %v462_v4 = vld [vmem:[%s452_s15] sm:$0xff]  ;;  %v463_v5 = vld [vmem:[%s452_s15 + $0x8] sm:$0xff]  ;;  %1509 = vmatpush3.msra.mxu1 %v632_v8  ;;  %v624_v27 = vld [vmem:[%s2167_s5 + $0x10] sm:$0xff]  ;;  %v847_v8 = vlaneseq  ;;  %s1399_s19 = sshll.u32 %s1846_s17, 1  ;;  %s1722_s0 = smov 96   ;;  %vm932_vm8 = vcmask 1041408  }
  0x1d   : > { %1504 = vmatmul.mubr.msk.f32.vlgmr.msra.gmra.mxu0 %vm474_vm1, %v465_v3  ;;  %562 = vperm.xlu0 %1639, %v462_v4   ;;  %v627_v22 = vld [vmem:[%s2167_s5 + $0x28] sm:$0xff]  ;;  %v626_v23 = vld [vmem:[%s2167_s5 + $0x20] sm:$0xff]  ;;  %v755_v57 = vld [vmem:[%s2169_s7 + $0x18] sm:$0xff]  ;;  %s1394_s17 = sshll.u32 %s440_s20, 4  ;;  %s1723_s1 = smov [#allocation3]  }
  0x1e   : > { %1510 = vmatprep.subr.mxu1 %v631_v9  ;;  %v623_v32 = vld [vmem:[%s2167_s5 + $0x8] sm:$0xff]  ;;  %v622_v34 = vld [vmem:[%s2167_s5] sm:$0xff]  ;;  %v754_v58 = vld [vmem:[%s2169_s7 + $0x10] sm:$0xff]  ;;  %1533 = vmatprep.subr.mxu0 %v755_v57 }
  0x1f   : > { %1511 = vmatpush3.msra.mxu1 %v631_v9  ;;  %1534 = vmatpush3.msra.mxu0 %v755_v57  ;;  %v1406_v59 = vld [vmem:[%s2168_s6] ss:$0 sm:$0xff]  ;;  %v753_v6 = vld [vmem:[%s2169_s7 + $0x8] sm:$0xff]  ;;  %v1960_v9 = vshrl.u32 %v847_v8, 7 }
  0x20   : > { %1512 = vmatprep.subr.mxu1 %v630_v15  ;;  %v1931_v41 = vld [vmem:[#allocation2] sm:$0xff]  ;;  %1535 = vmatprep.subr.mxu0 %v754_v58 }
  0x21   : > { %567 = vperm.xlu0 %1639, %v463_v5   ;;  %1513 = vmatpush3.msra.mxu1 %v630_v15  ;;  %v1925_v35 = vld [vmem:[#allocation2 + $0x18] sm:$0xff]  ;;  %v752_v7 = vld [vmem:[%s2169_s7] sm:$0xff] }
  0x22   : > { %1514 = vmatprep.subr.mxu1 %v629_v19  ;;  %v604_v37 = vrot.slane %v1925_v35, 2  ;;  %1536 = vmatpush3.msra.mxu0 %v754_v58 }
  0x23   : > { %1515 = vmatpush3.msra.mxu1 %v629_v19  ;;  %1537 = vmatprep.subr.mxu0 %v753_v6 }
  0x24   : > { %1516 = vmatprep.subr.mxu1 %v628_v21  ;;  %1538 = vmatpush3.msra.mxu0 %v753_v6 }
  0x25   : > { %1517 = vmatpush3.msra.mxu1 %v628_v21  ;;  %1539 = vmatprep.subr.mxu0 %v752_v7  ;;  %v1425_v21 = vld [vmem:[%s2167_s5 + $0xb8] sm:$0xff] }
  0x26   : > { %1518 = vmatprep.subr.mxu1 %v627_v22  ;;  %1540 = vmatpush3.msra.mxu0 %v752_v7 }
  0x27   : > { %1519 = vmatpush3.msra.mxu1 %v627_v22  ;;  %v1424_v22 = vld [vmem:[%s2167_s5 + $0xb0] sm:$0xff]  ;;  %1544 = vmatprep.subr.mxu0 %v1425_v21 }
  0x28   : > { %1520 = vmatprep.subr.mxu1 %v626_v23 }
  0x29   : > { %1521 = vmatpush3.msra.mxu1 %v626_v23  ;;  %v1423_v23 = vld [vmem:[%s2167_s5 + $0xa8] sm:$0xff] }
  0x2a   : > { %1522 = vmatprep.subr.mxu1 %v625_v24 }
  0x2b   : > { %1523 = vmatpush3.msra.mxu1 %v625_v24  ;;  %v1422_v24 = vld [vmem:[%s2167_s5 + $0xa0] sm:$0xff] }
  0x2c   : > { %1524 = vmatprep.subr.mxu1 %v624_v27 }
  0x2d   : > { %1525 = vmatpush3.msra.mxu1 %v624_v27 }
  0x2e   : > { %1526 = vmatprep.subr.mxu1 %v623_v32 }
  0x2f   : > { %1527 = vmatpush3.msra.mxu1 %v623_v32 }
  0x30   : > { %1528 = vmatprep.subr.mxu1 %v622_v34 }
  0x31   : > { %1529 = vmatpush3.msra.mxu1 %v622_v34 }
  0x98   : > { %v1874_v10 = vpop.permute.xlu0 %562 }
  0x9c   : > { %v1879_v13 = vpop.permute.xlu0 %567 }
  0xdd   : > { %v1505_v12 = vpop.f32.mrf.mxu0 }
  0xde   : > { %v557_v14 = vadd.f32 %v1505_v12, %v1402_v11 }
  0xdf   : > { %v551_v16 = vpop.f32.mrf.mxu0 }
  0xe0   : > { %v571_v17 = vmul.f32 %v1879_v13, %v557_v14  ;;  %v552_v18 = vadd.f32 %v1402_v11, %v551_v16  ;;  %v849_v11 = vsub.s32 0, %v1960_v9 }
  0xe2   : > { %578 = vst.msk [vmem:[#allocation2 + $0x10] sm:$0xff] %vm572_vm2, %v571_v17  ;;  %v570_v20 = vmul.f32 %v1874_v10, %v552_v18 }
  0xe4   : > { %577 = vst.msk [vmem:[#allocation2 + $0x8] sm:$0xff] %vm572_vm2, %v570_v20 }
  0xe9   : > { %v1903_v25 = vld [vmem:[#allocation2 + $0x10] sm:$0xff] }
  0xea   : > { %v588_v26 = vrot.slane %v1903_v25, 1  ;;  %v602_v31 = vrot.slane %v1903_v25, 2 }
  0xeb   : > { %v1909_v28 = vld [vmem:[#allocation2 + $0x8] sm:$0xff] }
  0xec   : > { %594 = vrot.lane.b32.xlu0 %v588_v26, %s2177_s29  ;;  %v587_v29 = vrot.slane %v1909_v28, 1  ;;  %v601_v30 = vrot.slane %v1909_v28, 2  ;;  %v605_v38 = vsel %vm600_vm3, %v602_v31, %v604_v37 }
  0xee   : > { %590 = vrot.lane.b32.xlu1 %v587_v29, %s2177_s29  ;;  %v603_v33 = vsel %vm600_vm3, %v601_v30, %v602_v31  ;;  %v589_v36 = vsel %vm586_vm4, %v587_v29, %v588_v26  ;;  %v1421_v26 = vld [vmem:[%s2167_s5 + $0x98] sm:$0xff]  ;;  %v1411_v29 = vld [vmem:[%s2170_s8] ss:$0 sm:$0xff] }
  0xf0   : > { %608 = vrot.lane.b32.xlu0 %v603_v33, %s2175_s26 }
  0xf2   : > { %606 = vrot.lane.b32.xlu1 %v601_v30, %s2175_s26 }
  0xf6   : > { %592 = vrot.lane.b32.xlu1 %v589_v36, %s2177_s29  ;;  %s456_s29 = scalar_lea.vmem %s2186_s2, %s1399_s19  ;;  %s2111_s19 = scalar_lea.sflag [#allocation4], %s440_s20 }
  0xf7   : > { %v1966_v14 = vld [vmem:[%s456_s29] sm:$0x3]  ;;  %s442_s29 = scalar_lea.vmem [#allocation3], %s1394_s17 }
  0xf8   : > { %v856_v16 = vrot.slane %v1966_v14, %v849_v11  ;;  %v1990_v27 = vadd.f32 1.0, %v1966_v14 }
  0xfa   : > { %610 = vrot.lane.b32.xlu1 %v605_v38, %s2175_s26  ;;  %v850_v32 = vrot.slane %v1990_v27, %v849_v11  ;;  %s2187_s26 = smov 32  }
 0x15e   : > { %v595_v40 = vpop.permute.xlu0 %594 }
 0x15f   : > { %v617_v51 = vsel %vm572_vm2, %v1903_v25, %v595_v40 }
 0x160   : > { %v591_v39 = vpop.permute.xlu1 %590 }
 0x161   : > { %v615_v43 = vsel %vm572_vm2, %v1931_v41, %v591_v39 }
 0x162   : > { %v609_v46 = vpop.permute.xlu0 %608 }
 0x164   : > { %v607_v42 = vpop.permute.xlu1 %606 }
 0x165   : > { %v619_v44 = vsel %vm618_vm5, %v615_v43, %v607_v42 }
 0x166   : > { %v645_v49 = vrot.slane %v619_v44, 7 }
 0x168   : > { %v593_v45 = vpop.permute.xlu1 %592 }
 0x169   : > { %v616_v47 = vsel %vm572_vm2, %v1909_v28, %v593_v45  ;;  %v1420_v45 = vld [vmem:[%s2167_s5 + $0x90] sm:$0xff] }
 0x16a   : > { %v620_v48 = vsel %vm618_vm5, %v616_v47, %v609_v46 }
 0x16b   : > { %v646_v50 = vrot.slane %v620_v48, 7  ;;  %v1419_v48 = vld [vmem:[%s2167_s5 + $0x88] sm:$0xff] }
 0x16c   : > { %v611_v52 = vpop.permute.xlu1 %610 }
 0x16d   : > { %v621_v53 = vsel %vm618_vm5, %v617_v51, %v611_v52  ;;  %v647_v54 = vsel %vm644_vm6, %v645_v49, %v646_v50  ;;  %v1415_v51 = vld [vmem:[%s2167_s5 + $0x68] sm:$0xff] }
 0x16e   : > { %v648_v55 = vrot.slane %v621_v53, 7  ;;  %1530 = vmatprep.mubr.msk.f32.mxu1 %vm650_vm7, %v647_v54  ;;  %v1414_v54 = vld [vmem:[%s2167_s5 + $0x60] sm:$0xff] }
 0x170   : > { %v649_v56 = vsel %vm644_vm6, %v646_v50, %v648_v55  ;;  %v1416_v50 = vld [vmem:[%s2167_s5 + $0x70] sm:$0xff] }
 0x171   : > { %1531 = vmatmul.mubr.msk.f32.vlgmr.msra.gmra.mxu1 %vm650_vm7, %v649_v56 }
 0x231   : > { %v1532_v60 = vpop.f32.mrf.mxu1 }
 0x232   : > { %v727_v61 = vadd.f32 %v1532_v60, %v1406_v59  ;;  %v891_v60 = vrot.slane %v1925_v35, 4 }
 0x233   : > { %v721_v62 = vpop.f32.mrf.mxu1 }
 0x234   : > { %v1410_v63 = vmul.f32 -1.442695, %v727_v61  ;;  %v722_v0 = vadd.f32 %v1406_v59, %v721_v62 }
 0x236   : > { %1640 = vpow2.f32 %v1410_v63  ;;  %v1409_v1 = vmul.f32 -1.442695, %v722_v0 }
 0x238   : > { %1642 = vpow2.f32 %v1409_v1 }
 0x243   : > { %v1641_v2 = vpop.eup %1640 }
 0x244   : > { %v737_v3 = vadd.f32 1.0, %v1641_v2 }
 0x245   : > { %v1643_v4 = vpop.eup %1642 }
 0x246   : > { %1644 = vrcp.f32 %v737_v3  ;;  %v736_v5 = vadd.f32 1.0, %v1643_v4 }
 0x248   : > { %1646 = vrcp.f32 %v736_v5 }
 0x253   : > { %v1645_v12 = vpop.eup %1644 }
 0x254   : > { %746 = vrot.lane.b32.xlu1 %v1645_v12, %s1722_s0 }
 0x255   : > { %v1647_v15 = vpop.eup %1646 }
 0x256   : > { %744 = vrot.lane.b32.xlu0 %v1647_v15, %s1722_s0 }
 0x25a   : > { %858 = vrot.lane.b32.xlu0 %v856_v16, %s1722_s0 }
 0x2c6   : > { %v747_v17 = vpop.permute.xlu1 %746 }
 0x2c7   : > { %v751_v20 = vmul.f32 %v747_v17, %v727_v61 }
 0x2c8   : > { %v745_v18 = vpop.permute.xlu0 %744 }
 0x2c9   : > { %v750_v19 = vmul.f32 %v745_v18, %v722_v0  ;;  %v1435_v18 = vld [vmem:[%s2169_s7 + $0x38] sm:$0xff] }
 0x2ca   : > { %1571 = vmatprep.subr.mxu1 %v1435_v18 }
 0x2cb   : > { %1541 = vmatprep.mubr.msk.f32.mxu0 %vm572_vm2, %v750_v19  ;;  %v1434_v19 = vld [vmem:[%s2169_s7 + $0x30] sm:$0xff]  ;;  %1572 = vmatpush3.msra.mxu1 %v1435_v18 }
 0x2cc   : > { %1542 = vmatmul.mubr.msk.f32.vlgmr.msra.gmra.mxu0 %vm572_vm2, %v751_v20  ;;  %v859_v37 = vpop.permute.xlu0 %858  ;;  %1573 = vmatprep.subr.mxu1 %v1434_v19  ;;  %v1427_v20 = vld [vmem:[%s2168_s6 + $0x1] ss:$0 sm:$0xff] }
 0x2cd   : > { %1545 = vmatpush3.msra.mxu0 %v1425_v21  ;;  %1574 = vmatpush3.msra.mxu1 %v1434_v19 }
 0x2ce   : > { %1546 = vmatprep.subr.mxu0 %v1424_v22 }
 0x2cf   : > { %1547 = vmatpush3.msra.mxu0 %v1424_v22 }
 0x2d0   : > { %1548 = vmatprep.subr.mxu0 %v1423_v23 }
 0x2d1   : > { %1549 = vmatpush3.msra.mxu0 %v1423_v23 }
 0x2d2   : > { %1550 = vmatprep.subr.mxu0 %v1422_v24 }
 0x2d3   : > { %1551 = vmatpush3.msra.mxu0 %v1422_v24 }
 0x2d4   : > { %1552 = vmatprep.subr.mxu0 %v1421_v26 }
 0x2d5   : > { %1553 = vmatpush3.msra.mxu0 %v1421_v26 }
 0x2d6   : > { %1554 = vmatprep.subr.mxu0 %v1420_v45 }
 0x2d7   : > { %1555 = vmatpush3.msra.mxu0 %v1420_v45 }
 0x2d8   : > { %1556 = vmatprep.subr.mxu0 %v1419_v48 }
 0x2d9   : > { %1557 = vmatpush3.msra.mxu0 %v1419_v48  ;;  %v1437_v48 = vld [vmem:[%s2170_s8 + $0x1] ss:$0 sm:$0xff] }
 0x38c   : > { %v1543_v30 = vpop.f32.mrf.mxu0 }
 0x38d   : > { %v841_v31 = vadd.f32 %v1543_v30, %v1411_v29 }
 0x38e   : > { %v835_v33 = vpop.f32.mrf.mxu0 }
 0x38f   : > { %v845_v34 = vmax.f32 %v841_v31, 0.0  ;;  %v836_v36 = vadd.f32 %v1411_v29, %v835_v33 }
 0x391   : > { %v852_v38 = vmul.f32 %v850_v32, %v845_v34  ;;  %v844_v39 = vmax.f32 %v836_v36, 0.0  ;;  %v1433_v34 = vld [vmem:[%s2169_s7 + $0x28] sm:$0xff]  ;;  %v1432_v36 = vld [vmem:[%s2169_s7 + $0x20] sm:$0xff] }
 0x392   : > { %1575 = vmatprep.subr.mxu1 %v1433_v34 }
 0x393   : > { %v851_v40 = vmul.f32 %v850_v32, %v844_v39  ;;  %v862_v42 = vadd.f32 %v859_v37, %v852_v38  ;;  %1576 = vmatpush3.msra.mxu1 %v1433_v34 }
 0x394   : > { %1577 = vmatprep.subr.mxu1 %v1432_v36 }
 0x395   : > { %v861_v43 = vadd.f32 %v859_v37, %v851_v40  ;;  %v864_v44 = vadd.f32 %v862_v42, %v1903_v25  ;;  %v1418_v25 = vld [vmem:[%s2167_s5 + $0x80] sm:$0xff]  ;;  %1578 = vmatpush3.msra.mxu1 %v1432_v36  ;;  %v1137_v37 = vsub.s32 1, %v1960_v9  ;;  %v1164_v9 = vld [vmem:[%s2171_s9 + $0x18] sm:$0xff] }
 0x396   : > { %1558 = vmatprep.subr.mxu0 %v1418_v25  ;;  %1582 = vmatprep.subr.mxu1 %v1164_v9 }
 0x397   : > { %v863_v46 = vadd.f32 %v861_v43, %v1909_v28  ;;  %v866_v47 = vmul.f32 %v864_v44, %v1879_v13  ;;  %1559 = vmatpush3.msra.mxu0 %v1418_v25  ;;  %v1417_v28 = vld [vmem:[%s2167_s5 + $0x78] sm:$0xff]  ;;  %v1144_v40 = vrot.slane %v1966_v14, %v1137_v37  ;;  %v1163_v14 = vld [vmem:[%s2171_s9 + $0x10] sm:$0xff] }
 0x398   : > { %1560 = vmatprep.subr.mxu0 %v1417_v28 }
 0x399   : > { %v865_v49 = vmul.f32 %v863_v46, %v1874_v10  ;;  %868 = vst.msk [vmem:[#allocation2 + $0x10] sm:$0xff] %vm572_vm2, %v866_v47  ;;  %1561 = vmatpush3.msra.mxu0 %v1417_v28  ;;  %v1162_v46 = vld [vmem:[%s2171_s9 + $0x8] sm:$0xff]  ;;  %v1161_v47 = vld [vmem:[%s2171_s9] sm:$0xff]  ;;  %v1138_v28 = vrot.slane %v1990_v27, %v1137_v37 }
 0x39a   : > { %1562 = vmatprep.subr.mxu0 %v1416_v50 }
 0x39b   : > { %867 = vst.msk [vmem:[#allocation2 + $0x8] sm:$0xff] %vm572_vm2, %v865_v49  ;;  %1563 = vmatpush3.msra.mxu0 %v1416_v50 }
 0x39c   : > { %1564 = vmatprep.subr.mxu0 %v1415_v51 }
 0x39d   : > { %1565 = vmatpush3.msra.mxu0 %v1415_v51 }
 0x39e   : > { %1566 = vmatprep.subr.mxu0 %v1414_v54 }
 0x39f   : > { %1567 = vmatpush3.msra.mxu0 %v1414_v54 }
 0x3a0   : > { %v2020_v52 = vld [vmem:[#allocation2 + $0x10] sm:$0xff] }
 0x3a1   : > { %v876_v53 = vrot.slane %v2020_v52, 2  ;;  %v889_v59 = vrot.slane %v2020_v52, 4 }
 0x3a2   : > { %v2026_v55 = vld [vmem:[#allocation2 + $0x8] sm:$0xff] }
 0x3a3   : > { %882 = vrot.lane.b32.xlu1 %v876_v53, %s2187_s26  ;;  %v888_v56 = vrot.slane %v2026_v55, 4  ;;  %v875_v57 = vrot.slane %v2026_v55, 2  ;;  %v892_v62 = vsel %vm481_vm0, %v889_v59, %v891_v60 }
 0x3a5   : > { %893 = vrot.lane.b32.xlu0 %v888_v56, %s2188_s28  ;;  %v877_v58 = vsel %vm600_vm3, %v875_v57, %v876_v53  ;;  %v890_v61 = vsel %vm481_vm0, %v888_v56, %v889_v59 }
 0x3a7   : > { %878 = vrot.lane.b32.xlu1 %v875_v57, %s2187_s26 }
 0x3a9   : > { %880 = vrot.lane.b32.xlu0 %v877_v58, %s2187_s26  ;;  %s1279_s26 = sshll.u32 %s442_s29, 4  ;;  %s2109_s26 = int_to_ptr.vmem [resolvable:$true] %s1279_s26 }
 0x3aa   : > { %s1656_s17 = scalar_lea.vmem %s2109_s26, 256 }
 0x3ab   : > { %895 = vrot.lane.b32.xlu1 %v890_v61, %s2188_s28  ;;  %p1657_p11 = scmp.ne.s32.totalorder %s2109_s26, %s1656_s17 }
 0x3ad   : > { %897 = vrot.lane.b32.xlu0 %v892_v62, %s2188_s28  ;;  %p1658_p12 = pnand %p1657_p11, %p1829_p5 }
 0x3af   : > { %p1659_p13 = pneg %p1658_p12 }
 0x415   : > { %v883_v63 = vpop.permute.xlu1 %882 }
 0x416   : > { %v904_v7 = vsel %vm572_vm2, %v2020_v52, %v883_v63 }
 0x417   : > { %v894_v0 = vpop.permute.xlu0 %893 }
 0x419   : > { %v879_v1 = vpop.permute.xlu1 %878 }
 0x41a   : > { %v902_v2 = vsel %vm572_vm2, %v1931_v41, %v879_v1 }
 0x41b   : > { %v881_v3 = vpop.permute.xlu0 %880  ;;  %v905_v4 = vsel %vm618_vm5, %v902_v2, %v894_v0 }
 0x41c   : > { %v903_v35 = vsel %vm572_vm2, %v2026_v55, %v881_v3  ;;  %v933_v8 = vrot.slane %v905_v4, 6 }
 0x41d   : > { %v896_v5 = vpop.permute.xlu1 %895 }
 0x41e   : > { %v906_v6 = vsel %vm618_vm5, %v903_v35, %v896_v5 }
 0x41f   : > { %v934_v11 = vrot.slane %v906_v6, 6  ;;  %v898_v12 = vpop.permute.xlu0 %897 }
 0x420   : > { %v907_v15 = vsel %vm618_vm5, %v904_v7, %v898_v12 }
 0x421   : > { %v936_v16 = vrot.slane %v907_v15, 6  ;;  %v935_v41 = vsel %vm932_vm8, %v933_v8, %v934_v11 }
 0x422   : > { %1568 = vmatprep.mubr.msk.f32.mxu0 %vm650_vm7, %v935_v41 }
 0x423   : > { %v937_v17 = vsel %vm932_vm8, %v934_v11, %v936_v16 }
 0x424   : > { %1569 = vmatmul.mubr.msk.f32.vlgmr.msra.gmra.mxu0 %vm650_vm7, %v937_v17 }
 0x4e4   : > { %v1570_v21 = vpop.f32.mrf.mxu0 }
 0x4e5   : > { %v1014_v22 = vadd.f32 %v1570_v21, %v1427_v20 }
 0x4e6   : > { %v1008_v23 = vpop.f32.mrf.mxu0 }
 0x4e7   : > { %v1431_v24 = vmul.f32 -1.442695, %v1014_v22  ;;  %v1009_v26 = vadd.f32 %v1427_v20, %v1008_v23 }
 0x4e9   : > { %1648 = vpow2.f32 %v1431_v24  ;;  %v1430_v29 = vmul.f32 -1.442695, %v1009_v26 }
 0x4eb   : > { %1650 = vpow2.f32 %v1430_v29 }
 0x4f6   : > { %v1649_v30 = vpop.eup %1648 }
 0x4f7   : > { %v1024_v31 = vadd.f32 1.0, %v1649_v30 }
 0x4f8   : > { %v1651_v32 = vpop.eup %1650 }
 0x4f9   : > { %1652 = vrcp.f32 %v1024_v31  ;;  %v1023_v33 = vadd.f32 1.0, %v1651_v32 }
 0x4fb   : > { %1654 = vrcp.f32 %v1023_v33 }
 0x506   : > { %v1653_v38 = vpop.eup %1652 }
 0x507   : > { %1033 = vrot.lane.b32.xlu0 %v1653_v38, %s1722_s0 }
 0x508   : > { %v1655_v39 = vpop.eup %1654 }
 0x509   : > { %1031 = vrot.lane.b32.xlu1 %v1655_v39, %s1722_s0 }
 0x50d   : > { %1146 = vrot.lane.b32.xlu1 %v1144_v40, %s1722_s0  ;;  %s1451_s0 = sshll.u32 %s1812_s25, 8  ;;  %s1660_s25 = sshll.u32 %s1723_s1, 4  ;;  %s1661_s25 = int_to_ptr.vmem [resolvable:$false] %s1660_s25 }
 0x50e   : > { %s2107_s16 = scalar_lea.hbm %s2174_s12, %s1451_s0  ;;  %p1663_p0 = scmp.lt.s32.totalorder %s2109_s26, %s1661_s25 }
 0x579   : > { %v1034_v42 = vpop.permute.xlu0 %1033 }
 0x57a   : > { %v1038_v45 = vmul.f32 %v1034_v42, %v1014_v22 }
 0x57b   : > { %v1032_v43 = vpop.permute.xlu1 %1031 }
 0x57c   : > { %v1037_v44 = vmul.f32 %v1032_v43, %v1009_v26 }
 0x57e   : > { %1579 = vmatprep.mubr.msk.f32.mxu1 %vm572_vm2, %v1037_v44 }
 0x57f   : > { %1580 = vmatmul.mubr.msk.f32.vlgmr.msra.gmra.mxu1 %vm572_vm2, %v1038_v45  ;;  %v1147_v54 = vpop.permute.xlu1 %1146 }
 0x580   : > { %1583 = vmatpush3.msra.mxu1 %v1164_v9 }
 0x581   : > { %1584 = vmatprep.subr.mxu1 %v1163_v14 }
 0x582   : > { %1585 = vmatpush3.msra.mxu1 %v1163_v14 }
 0x583   : > { %1586 = vmatprep.subr.mxu1 %v1162_v46 }
 0x584   : > { %1587 = vmatpush3.msra.mxu1 %v1162_v46 }
 0x585   : > { %1588 = vmatprep.subr.mxu1 %v1161_v47 }
 0x586   : > { %1589 = vmatpush3.msra.mxu1 %v1161_v47 }
 0x63f   : > { %v1581_v49 = vpop.f32.mrf.mxu1 }
 0x640   : > { %v1130_v25 = vadd.f32 %v1581_v49, %v1437_v48 }
 0x641   : > { %v1124_v50 = vpop.f32.mrf.mxu1 }
 0x642   : > { %v1134_v51 = vmax.f32 %v1130_v25, 0.0  ;;  %v1125_v53 = vadd.f32 %v1437_v48, %v1124_v50 }
 0x644   : > { %v1133_v56 = vmax.f32 %v1125_v53, 0.0  ;;  %v1140_v57 = vmul.f32 %v1138_v28, %v1134_v51 }
 0x646   : > { %v1139_v58 = vmul.f32 %v1138_v28, %v1133_v56  ;;  %v1150_v59 = vadd.f32 %v1147_v54, %v1140_v57 }
 0x648   : > { %v1149_v60 = vadd.f32 %v1147_v54, %v1139_v58  ;;  %v1152_v61 = vadd.f32 %v1150_v59, %v2020_v52 }
 0x64a   : > { %v1151_v62 = vadd.f32 %v1149_v60, %v2026_v55  ;;  %v1154_v63 = vmul.f32 %v1152_v61, %v1879_v13 }
 0x64c   : > { %v1153_v27 = vmul.f32 %v1151_v62, %v1874_v10  ;;  %1156 = vst.msk [vmem:[#allocation2 + $0x10] sm:$0xff] %vm572_vm2, %v1154_v63  ;;  %v1158_v0 = vmul.f32 %v1154_v63, %v1879_v13 }
 0x64e   : > { %1155 = vst.msk [vmem:[#allocation2 + $0x8] sm:$0xff] %vm572_vm2, %v1153_v27  ;;  %v1157_v1 = vmul.f32 %v1153_v27, %v1874_v10  ;;  %1590 = vmatprep.mubr.msk.f32.mxu1 %vm572_vm2, %v1153_v27  ;;  %1160 = vst.msk [vmem:[%s442_s29 + $0x8] sm:$0xff] %vm572_vm2, %v1158_v0 }
 0x64f   : > { %1591 = vmatmul.mubr.msk.f32.vlgmr.msra.gmra.mxu1 %vm572_vm2, %v1154_v63 }
 0x650   : > { %1159 = vst.msk [vmem:[%s442_s29] sm:$0xff] %vm572_vm2, %v1157_v1  ;;  %s1662_s29 = scalar_lea.vmem %s1661_s25, 512 }
 0x651   : > { %p1664_p1 = scmp.lt.s32.totalorder %s1662_s29, %s1656_s17 }
 0x653   : > { %p1665_p2 = por %p1664_p1, %p1663_p0 }
 0x655   : > { %p1666_p3 = pnand %p1665_p2, %p1659_p13 }
 0x657   : > { %1669 = shalt.err (!%p1666_p3)
}
 0x658   : > { %s1670_s20 = scalar_lea.hbm %s2107_s16, 256  ;;  %s1674_s1 = scalar_lea.hbm %s2174_s12, 512 }
 0x659   : > { %p1671_p4 = scmp.ne.s32.totalorder %s2107_s16, %s1670_s20  ;;  %p1675_p9 = scmp.lt.s32.totalorder %s2107_s16, %s2174_s12 }
 0x65a   : > { %p1676_p10 = scmp.lt.s32.totalorder %s1674_s1, %s1670_s20 }
 0x65b   : > { %p1672_p7 = pnand %p1671_p4, %p1829_p5 }
 0x65c   : > { %p1677_p11 = por %p1676_p10, %p1675_p9 }
 0x65d   : > { %p1673_p8 = pneg %p1672_p7 }
 0x65f   : > { %p1678_p12 = pnand %p1677_p11, %p1673_p8 }
 0x661   : > { %1681 = shalt.err (!%p1678_p12)
}
 0x662   : > { %s1724_s17 = smov 128   ;;  %s1725_s25 = smov 8   ;;  %v1440_v52 = vld [vmem:[%s2172_s10] ss:$0 sm:$0xff] }
 0x663   : > { %1593 = dma.vmem_to_hbm [thread:$0]  (%p1829_p5), %s2109_s26, 256, %s2107_s16, %s2111_s19, %s1724_s17, %s1724_s17, %s1725_s25  }
 0x664   : > { %s461_s28 = scalar_lea.vmem %s2173_s11, %s1849_s18 }
 0x70f   : > { %v1592_v55 = vpop.f32.mrf.mxu1 }
 0x710   : > { %v1250_v2 = vadd.f32 %v1592_v55, %v1440_v52 }
 0x711   : > { %v1244_v3 = vpop.f32.mrf.mxu1 }
 0x712   : > { %v1254_v4 = vmul.f32 %v1250_v2, %v1879_v13  ;;  %v1245_v35 = vadd.f32 %v1440_v52, %v1244_v3 }
 0x714   : > { %1256 = vst.msk [vmem:[%s461_s28 + $0x8] sm:$0xff] %vm474_vm1, %v1254_v4  ;;  %v1253_v5 = vmul.f32 %v1245_v35, %v1874_v10 }
 0x716   : > { %1255 = vst.msk [vmem:[%s461_s28] sm:$0xff] %vm474_vm1, %v1253_v5 }
 0x717 PF: > { %p1599_p5 = scmp.ge.s32.totalorder %s1716_s24, 2  ;;  %s1302_s13 = sand.u32 1, %s1704_s21  }
 0x718   : > { %s1303_s18 = scalar_lea.sflag [#allocation4], %s1302_s13 }
 0x719   : > { %p1596_p13 = pnand %p1599_p5, %p1833_p6 }
 0x71b   : > { %p1597_p0 = pneg %p1596_p13 }
 0x71d   : > { %1699 = dma.done.wait (%p1597_p0), %s1303_s18, 256  }
 0x71e   : > { %1701 = vsyncadd (%p1597_p0), %s1303_s18, 4294967040  ;;  %p23_p1 = scmp.ge.s32.totalorder %s1816_s27, 4   ;;  %s2189_s21 = smov %s1708_s22 }
 0x71f   : > { %s2190_s22 = smov %s1712_s23  ;;  %s2191_s23 = smov %s1827_s30 }
 0x720   : > { %s2192_s24 = smov %s1816_s27  ;;  %25 = sbr.rel (!%p23_p1) target bundleno = 7 (0x7), region = 121 }
 0x725   :  { %1308 = vsyncpa [#allocation4], 1 }
 0x726   :  { %1310 = vsyncpa [#allocation4 + $0x1], 1 }

</bundles_post_ra>
